<compile_context>
chip_gen: v7x
topology: tpu7x:2x2x1
jax: 0.10.0
libtpu: 0.0.40
codegen_flags: <defaults>
</compile_context>

<pallas_src>
import math
import functools

import jax
import jax.numpy as jnp
from jax.experimental import pallas as pl
from jax.experimental.pallas import tpu as pltpu


# ----------------------------- in-kernel helpers -----------------------------

def _layernorm(x, gamma, beta, eps=1e-5):
    mean = jnp.mean(x, axis=-1, keepdims=True)
    var = jnp.mean((x - mean) ** 2, axis=-1, keepdims=True)
    return (x - mean) * jax.lax.rsqrt(var + eps) * gamma + beta


def _gelu_tanh(x):
    # Matches the PyTorch GELUActivation (tanh approximation) exactly.
    c = math.sqrt(2.0 / math.pi)
    return 0.5 * x * (1.0 + jnp.tanh(c * (x + 0.044715 * x * x * x)))


# --------------------------------- kernel ------------------------------------

def encoder_kernel(x_ref,
                   ln1g_ref, ln1b_ref,
                   wqkv_ref, bqkv_ref, wo_ref, bo_ref,
                   ln2g_ref, ln2b_ref,
                   w1_ref, b1_ref, w2_ref, b2_ref,
                   o_ref, *, num_heads, mlp_row_chunks):
    """One (batch block, layer) grid step of the ViT encoder."""
    layer = pl.program_id(1)
    bf16, f32 = jnp.bfloat16, jnp.float32

    # The output block (same block index across the layer axis) is the
    # VMEM-resident residual-stream accumulator -- no separate scratch.
    @pl.when(layer == 0)
    def _():
        o_ref[...] = x_ref[...]

    Bb, S, H = o_ref.shape
    nh = num_heads
    hd = H // nh
    rows = Bb * S

    x = o_ref[...].reshape(rows, H)                               # (Bb*S, H) f32

    # ---------------- attention branch ----------------
    h = _layernorm(x, ln1g_ref[...], ln1b_ref[...])
    # 1/sqrt(hd) is pre-folded into the q columns of wqkv / bqkv.
    qkv = jnp.dot(h.astype(bf16), wqkv_ref[...],
                  preferred_element_type=f32) + bqkv_ref[...]     # (rows, 3H) f32

    wo = wo_ref[...]                                              # (H, H) bf16
    attn_parts = []
    for b in range(Bb):                     # static unroll over batch elements
        qkv_b = qkv[b * S:(b + 1) * S, :]   # (S, 3H)
        out_b = jnp.zeros((S, H), f32)
        for hh in range(nh):                # static unroll over heads
            lo = hh * hd
            # Static lane slices of qkv: no (S,nh,hd) reshape/swapaxes relayout.
            qh = qkv_b[:, 0 * H + lo:0 * H + lo + hd].astype(bf16)    # (S, hd)
            kh = qkv_b[:, 1 * H + lo:1 * H + lo + hd].astype(bf16)
            vh = qkv_b[:, 2 * H + lo:2 * H + lo + hd].astype(bf16)
            s = jax.lax.dot_general(qh, kh, (((1,), (1,)), ((), ())),
                                    preferred_element_type=f32)       # (S, S)
            m = jnp.max(s, axis=-1, keepdims=True)
            e = jnp.exp(s - m)
            denom = jnp.sum(e, axis=-1, keepdims=True)
            ctx = jnp.dot(e.astype(bf16), vh,
                          preferred_element_type=f32)                 # (S, hd)
            # Deferred softmax normalization: scale (S,hd) ctx, not (S,S) probs.
            ctx = ctx * pl.reciprocal(denom, approx=True)
            # Folded concat + output projection: accumulate ctx_h @ wo[h rows].
            out_b = out_b + jnp.dot(ctx.astype(bf16), wo[lo:lo + hd, :],
                                    preferred_element_type=f32)
        attn_parts.append(out_b)
    attn = attn_parts[0] if Bb == 1 else jnp.concatenate(attn_parts, axis=0)
    x = x + attn + bo_ref[...]                                    # residual 1

    # -------------------- MLP branch -------------------
    # Row-chunked so one chunk's EUP tanh / VPU bias work overlaps the next
    # chunk's MXU matmuls.
    ln2g, ln2b = ln2g_ref[...], ln2b_ref[...]
    w1, b1 = w1_ref[...], b1_ref[...]
    w2, b2 = w2_ref[...], b2_ref[...]
    chunk = rows // mlp_row_chunks
    y_parts = []
    for c in range(mlp_row_chunks):
        xc = x[c * chunk:(c + 1) * chunk, :]
        hc = _layernorm(xc, ln2g, ln2b)
        hc = jnp.dot(hc.astype(bf16), w1, preferred_element_type=f32) + b1
        hc = _gelu_tanh(hc)
        hc = jnp.dot(hc.astype(bf16), w2, preferred_element_type=f32) + b2
        y_parts.append(xc + hc)                                   # residual 2
    x = y_parts[0] if mlp_row_chunks == 1 else jnp.concatenate(y_parts, axis=0)

    o_ref[...] = x.reshape(Bb, S, H)


# --------------------------------- wrapper ------------------------------------

def encoder_forward(x, params, num_heads, *, batch_block=None,
                    mlp_row_chunks=2, vmem_limit_bytes=32 * 1024 * 1024):
    """Full Encoder via one pallas_call; grid = (B // Bb, L)."""
    B, S, H = x.shape
    L = params["wqkv"].shape[0]
    inter = params["w1"].shape[-1]

    if batch_block is None:
        # Largest divisor of B that is <= 8: amortize each per-layer weight
        # fetch over Bb batch elements (Bb*S rows of MXU work per fetch).
        batch_block = max(d for d in range(1, min(B, 8) + 1) if B % d == 0)
    Bb = batch_block
    assert B % Bb == 0, "batch_block must divide the batch size"
    if (Bb * S) % mlp_row_chunks != 0:
        mlp_row_chunks = 1

    def per_layer(*trailing):
        # Stacked (L, *trailing) parameter: select layer l, squeeze the L dim.
        n = len(trailing)
        return pl.BlockSpec((None,) + tuple(trailing),
                            lambda bb, l: (l,) + (0,) * n)

    in_specs = [
        pl.BlockSpec((Bb, S, H), lambda bb, l: (bb, 0, 0)),   # x (Bb elements)
        per_layer(1, H), per_layer(1, H),                     # ln1 gamma / beta
        per_layer(H, 3 * H), per_layer(1, 3 * H),             # qkv projection
        per_layer(H, H), per_layer(1, H),                     # output projection
        per_layer(1, H), per_layer(1, H),                     # ln2 gamma / beta
        per_layer(H, inter), per_layer(1, inter),             # mlp dense_1
        per_layer(inter, H), per_layer(1, H),                 # mlp dense_2
    ]
    out_specs = pl.BlockSpec((Bb, S, H), lambda bb, l: (bb, 0, 0))

    y = pl.pallas_call(
        functools.partial(encoder_kernel, num_heads=num_heads,
                          mlp_row_chunks=mlp_row_chunks),
        grid=(B // Bb, L),                 # layer axis innermost (sequential)
        in_specs=in_specs,
        out_specs=out_specs,
        out_shape=jax.ShapeDtypeStruct((B, S, H), jnp.float32),
        compiler_params=pltpu.CompilerParams(
            dimension_semantics=("parallel", "arbitrary"),
            vmem_limit_bytes=vmem_limit_bytes),
    )(x,
      params["ln1_g"], params["ln1_b"],
      params["wqkv"], params["bqkv"], params["wo"], params["bo"],
      params["ln2_g"], params["ln2_b"],
      params["w1"], params["b1"], params["w2"], params["b2"])
    # Mirrors Encoder.forward with output_attentions=False -> (x, None)
    return y, None


# ----------------------- one-time parameter preprocessing ----------------------

def fold_attention_scale(params, num_heads):
    """Fold 1/sqrt(head_dim) into the q columns of wqkv / bqkv (one time)."""
    H = params["wo"].shape[-1]
    hd = H // num_heads
    scale = 1.0 / math.sqrt(hd)
    wqkv, bqkv = params["wqkv"], params["bqkv"]
    wq = (wqkv[..., :H].astype(jnp.float32) * scale).astype(wqkv.dtype)
    bq = bqkv[..., :H] * scale
    out = dict(params)
    out["wqkv"] = jnp.concatenate([wq, wqkv[..., H:]], axis=-1)
    out["bqkv"] = jnp.concatenate([bq, bqkv[..., H:]], axis=-1)
    return out


# ------------------------ pure-JAX reference (checking) -----------------------

def _encoder_ref(x, p, num_heads):
    """Float32 reference mirroring the PyTorch Encoder (spec semantics)."""
    L = p["wqkv"].shape[0]
    B, S, H = x.shape
    hd = H // num_heads
    for l in range(L):
        h = _layernorm(x, p["ln1_g"][l], p["ln1_b"][l])
        qkv = h @ p["wqkv"][l].astype(jnp.float32) + p["bqkv"][l]
        q, k, v = jnp.split(qkv, 3, axis=-1)

        def heads(t):  # (B,S,H) -> (B,nh,S,hd)
            return t.reshape(B, S, num_heads, hd).transpose(0, 2, 1, 3)

        qh, kh, vh = heads(q), heads(k), heads(v)
        w = jnp.einsum("bhqd,bhkd->bhqk", qh, kh) / math.sqrt(hd)
        prob = jax.nn.softmax(w, axis=-1)
        a = jnp.einsum("bhqk,bhkd->bhqd", prob, vh)
        a = a.transpose(0, 2, 1, 3).reshape(B, S, H)
        a = a @ p["wo"][l].astype(jnp.float32) + p["bo"][l]
        x = x + a
        h2 = _layernorm(x, p["ln2_g"][l], p["ln2_b"][l])
        h2 = _gelu_tanh(h2 @ p["w1"][l].astype(jnp.float32) + p["b1"][l])
        h2 = h2 @ p["w2"][l].astype(jnp.float32) + p["b2"][l]
        x = x + h2
    return x


# ----------------------------- parameter init ---------------------------------

def init_encoder_params(key, num_layers, hidden, intermediate):
    f32 = jnp.float32

    def one_layer(k):
        ks = jax.random.split(k, 8)
        return {
            "ln1_g": jnp.ones((1, hidden), f32),
            "ln1_b": jnp.zeros((1, hidden), f32),
            # weights stored as (in, out) = PyTorch W^T, so y = x @ W + b
            "wqkv": 0.02 * jax.random.normal(ks[0], (hidden, 3 * hidden), f32),
            "bqkv": 0.02 * jax.random.normal(ks[1], (1, 3 * hidden), f32),
            "wo":   0.02 * jax.random.normal(ks[2], (hidden, hidden), f32),
            "bo":   0.02 * jax.random.normal(ks[3], (1, hidden), f32),
            "ln2_g": jnp.ones((1, hidden), f32),
            "ln2_b": jnp.zeros((1, hidden), f32),
            "w1":   0.02 * jax.random.normal(ks[4], (hidden, intermediate), f32),
            "b1":   0.02 * jax.random.normal(ks[5], (1, intermediate), f32),
            "w2":   0.02 * jax.random.normal(ks[6], (intermediate, hidden), f32),
            "b2":   0.02 * jax.random.normal(ks[7], (1, hidden), f32),
        }

    layers = [one_layer(k) for k in jax.random.split(key, num_layers)]
    stacked = {name: jnp.stack([lp[name] for lp in layers], axis=0)
               for name in layers[0]}
    # Matmul weights in bf16 (native MXU input); LN params / biases stay f32.
    for name in ("wqkv", "wo", "w1", "w2"):
        stacked[name] = stacked[name].astype(jnp.bfloat16)
    return stacked


# ----------------------------------- main --------------------------------------

if __name__ == "__main__":
    config = {
        "hidden_size": 32,
        "intermediate_size": 64,
        "num_attention_heads": 4,
        "num_hidden_layers": 2,
        "qkv_bias": True,
    }
    B, S = 2, 8
    H = config["hidden_size"]

    key = jax.random.PRNGKey(0)
    kx, kp = jax.random.split(key)
    x = jax.random.normal(kx, (B, S, H), jnp.float32)
    params = init_encoder_params(kp, config["num_hidden_layers"],
                                 config["hidden_size"],
                                 config["intermediate_size"])
    # One-time preprocessing (not per-call work): fold attention scale into q.
    kernel_params = fold_attention_scale(params, config["num_attention_heads"])

    out, attns = encoder_forward(x, kernel_params,
                                 config["num_attention_heads"])
    out = jax.block_until_ready(out)
    assert attns is None

    ref = _encoder_ref(x, params, config["num_attention_heads"])
    # bf16 matmul operands + approx reciprocal => small deviation vs f32 reference.
    if not jnp.allclose(out, ref, atol=1e-2, rtol=1e-2):
        err = jnp.max(jnp.abs(out - ref))
        raise AssertionError(
            f"Pallas encoder output does not match JAX reference (max abs err {err})")
    print("KERNEL_OK")
</pallas_src>

<mosaic_0001>
module attributes {stable_mosaic.version = 11 : i64} {
  func.func @encoder_kernel(%arg0: i32, %arg1: i32, %arg2: memref<2x8x32xf32, #tpu.memory_space<vmem>>, %arg3: memref<1x1x32xf32, #tpu.memory_space<vmem>>, %arg4: memref<1x1x32xf32, #tpu.memory_space<vmem>>, %arg5: memref<1x32x96xbf16, #tpu.memory_space<vmem>>, %arg6: memref<1x1x96xf32, #tpu.memory_space<vmem>>, %arg7: memref<1x32x32xbf16, #tpu.memory_space<vmem>>, %arg8: memref<1x1x32xf32, #tpu.memory_space<vmem>>, %arg9: memref<1x1x32xf32, #tpu.memory_space<vmem>>, %arg10: memref<1x1x32xf32, #tpu.memory_space<vmem>>, %arg11: memref<1x32x64xbf16, #tpu.memory_space<vmem>>, %arg12: memref<1x1x64xf32, #tpu.memory_space<vmem>>, %arg13: memref<1x64x32xbf16, #tpu.memory_space<vmem>>, %arg14: memref<1x1x32xf32, #tpu.memory_space<vmem>>, %arg15: memref<2x8x32xf32, #tpu.memory_space<vmem>>) attributes {dimension_semantics = [#tpu.dimension_semantics<parallel>, #tpu.dimension_semantics<arbitrary>], iteration_bounds = array<i64: 1, 2>, scalar_prefetch = 0 : i64, scratch_operands = 0 : i64, tpu.core_type = #tpu.core_type<tc>, window_params = [{transform_indices = @transform_0, window_bounds = array<i64: 2, 8, 32>}, {transform_indices = @transform_1, window_bounds = array<i64: 1, 1, 32>}, {transform_indices = @transform_2, window_bounds = array<i64: 1, 1, 32>}, {transform_indices = @transform_3, window_bounds = array<i64: 1, 32, 96>}, {transform_indices = @transform_4, window_bounds = array<i64: 1, 1, 96>}, {transform_indices = @transform_5, window_bounds = array<i64: 1, 32, 32>}, {transform_indices = @transform_6, window_bounds = array<i64: 1, 1, 32>}, {transform_indices = @transform_7, window_bounds = array<i64: 1, 1, 32>}, {transform_indices = @transform_8, window_bounds = array<i64: 1, 1, 32>}, {transform_indices = @transform_9, window_bounds = array<i64: 1, 32, 64>}, {transform_indices = @transform_10, window_bounds = array<i64: 1, 1, 64>}, {transform_indices = @transform_11, window_bounds = array<i64: 1, 64, 32>}, {transform_indices = @transform_12, window_bounds = array<i64: 1, 1, 32>}, {transform_indices = @transform_13, window_bounds = array<i64: 2, 8, 32>}]} {
    %c0_i32 = arith.constant 0 : i32
    %0 = arith.cmpi eq, %arg1, %c0_i32 : i32
    %1 = arith.extui %0 : i1 to i32
    %c0_i32_0 = arith.constant 0 : i32
    %2 = arith.cmpi ne, %1, %c0_i32_0 : i32
    scf.if %2 {
      %c0_111 = arith.constant 0 : index
      %c0_112 = arith.constant 0 : index
      %c0_113 = arith.constant 0 : index
      %340 = vector.load %arg2[%c0_111, %c0_112, %c0_113] : memref<2x8x32xf32, #tpu.memory_space<vmem>>, vector<2x8x32xf32>
      %c0_114 = arith.constant 0 : index
      %c0_115 = arith.constant 0 : index
      %c0_116 = arith.constant 0 : index
      %341 = vector.load %arg15[%c0_114, %c0_115, %c0_116] : memref<2x8x32xf32, #tpu.memory_space<vmem>>, vector<2x8x32xf32>
      tpu.vector_store %arg15[%c0_114, %c0_115, %c0_116], %340 {strides = array<i32>} : memref<2x8x32xf32, #tpu.memory_space<vmem>>, vector<2x8x32xf32>,
    } else {
    }
    %c0 = arith.constant 0 : index
    %c0_1 = arith.constant 0 : index
    %c0_2 = arith.constant 0 : index
    %3 = vector.load %arg15[%c0, %c0_1, %c0_2] : memref<2x8x32xf32, #tpu.memory_space<vmem>>, vector<2x8x32xf32>
    %4 = vector.shape_cast %3 : vector<2x8x32xf32> to vector<16x32xf32>
    %c0_3 = arith.constant 0 : index
    %c0_4 = arith.constant 0 : index
    %c0_5 = arith.constant 0 : index
    %5 = vector.load %arg3[%c0_3, %c0_4, %c0_5] : memref<1x1x32xf32, #tpu.memory_space<vmem>>, vector<1x1x32xf32>
    %6 = vector.shape_cast %5 : vector<1x1x32xf32> to vector<1x32xf32>
    %c0_6 = arith.constant 0 : index
    %c0_7 = arith.constant 0 : index
    %c0_8 = arith.constant 0 : index
    %7 = vector.load %arg4[%c0_6, %c0_7, %c0_8] : memref<1x1x32xf32, #tpu.memory_space<vmem>>, vector<1x1x32xf32>
    %8 = vector.shape_cast %7 : vector<1x1x32xf32> to vector<1x32xf32>
    %cst = arith.constant dense<0.000000e+00> : vector<16xf32>
    %9 = vector.multi_reduction <add>, %4, %cst [1] : vector<16x32xf32> to vector<16xf32>
    %10 = vector.shape_cast %9 : vector<16xf32> to vector<16x1xf32>
    %cst_9 = arith.constant 3.200000e+01 : f32
    %11 = vector.broadcast %cst_9 : f32 to vector<16x1xf32>
    %12 = arith.divf %10, %11 : vector<16x1xf32>
    %13 = vector.broadcast %12 : vector<16x1xf32> to vector<16x32xf32>
    %14 = arith.subf %4, %13 : vector<16x32xf32>
    %15 = arith.mulf %14, %14 : vector<16x32xf32>
    %cst_10 = arith.constant dense<0.000000e+00> : vector<16xf32>
    %16 = vector.multi_reduction <add>, %15, %cst_10 [1] : vector<16x32xf32> to vector<16xf32>
    %17 = vector.shape_cast %16 : vector<16xf32> to vector<16x1xf32>
    %cst_11 = arith.constant 3.200000e+01 : f32
    %18 = vector.broadcast %cst_11 : f32 to vector<16x1xf32>
    %19 = arith.divf %17, %18 : vector<16x1xf32>
    %20 = vector.broadcast %12 : vector<16x1xf32> to vector<16x32xf32>
    %21 = arith.subf %4, %20 : vector<16x32xf32>
    %cst_12 = arith.constant 9.99999974E-6 : f32
    %22 = vector.broadcast %cst_12 : f32 to vector<16x1xf32>
    %23 = arith.addf %19, %22 : vector<16x1xf32>
    %24 = math.rsqrt %23 : vector<16x1xf32>
    %25 = vector.broadcast %24 : vector<16x1xf32> to vector<16x32xf32>
    %26 = arith.mulf %21, %25 : vector<16x32xf32>
    %27 = vector.broadcast %6 : vector<1x32xf32> to vector<16x32xf32>
    %28 = arith.mulf %26, %27 : vector<16x32xf32>
    %29 = vector.broadcast %8 : vector<1x32xf32> to vector<16x32xf32>
    %30 = arith.addf %28, %29 : vector<16x32xf32>
    %31 = arith.truncf %30 : vector<16x32xf32> to vector<16x32xbf16>
    %c0_13 = arith.constant 0 : index
    %c0_14 = arith.constant 0 : index
    %c0_15 = arith.constant 0 : index
    %32 = vector.load %arg5[%c0_13, %c0_14, %c0_15] : memref<1x32x96xbf16, #tpu.memory_space<vmem>>, vector<1x32x96xbf16>
    %33 = vector.shape_cast %32 : vector<1x32x96xbf16> to vector<32x96xbf16>
    %cst_16 = arith.constant dense<0.000000e+00> : vector<16x96xf32>
    %34 = tpu.matmul %31, %33, %cst_16 {dimension_numbers = #tpu.dot_dimension_numbers<[1], [0], [0], [1], [0, 0, 1, 1], [], []>} : vector<16x32xbf16>, vector<32x96xbf16>, vector<16x96xf32> -> vector<16x96xf32>
    %c0_17 = arith.constant 0 : index
    %c0_18 = arith.constant 0 : index
    %c0_19 = arith.constant 0 : index
    %35 = vector.load %arg6[%c0_17, %c0_18, %c0_19] : memref<1x1x96xf32, #tpu.memory_space<vmem>>, vector<1x1x96xf32>
    %36 = vector.shape_cast %35 : vector<1x1x96xf32> to vector<1x96xf32>
    %37 = vector.broadcast %36 : vector<1x96xf32> to vector<16x96xf32>
    %38 = arith.addf %34, %37 : vector<16x96xf32>
    %c0_20 = arith.constant 0 : index
    %c0_21 = arith.constant 0 : index
    %c0_22 = arith.constant 0 : index
    %39 = vector.load %arg7[%c0_20, %c0_21, %c0_22] : memref<1x32x32xbf16, #tpu.memory_space<vmem>>, vector<1x32x32xbf16>
    %40 = vector.shape_cast %39 : vector<1x32x32xbf16> to vector<32x32xbf16>
    %41 = vector.extract_strided_slice %38 {offsets = [0, 0], sizes = [8, 96], strides = [1, 1]} : vector<16x96xf32> to vector<8x96xf32>
    %cst_23 = arith.constant 0.000000e+00 : f32
    %42 = vector.broadcast %cst_23 : f32 to vector<8x32xf32>
    %43 = vector.extract_strided_slice %41 {offsets = [0, 0], sizes = [8, 8], strides = [1, 1]} : vector<8x96xf32> to vector<8x8xf32>
    %44 = arith.truncf %43 : vector<8x8xf32> to vector<8x8xbf16>
    %45 = vector.extract_strided_slice %41 {offsets = [0, 32], sizes = [8, 8], strides = [1, 1]} : vector<8x96xf32> to vector<8x8xf32>
    %46 = arith.truncf %45 : vector<8x8xf32> to vector<8x8xbf16>
    %47 = vector.extract_strided_slice %41 {offsets = [0, 64], sizes = [8, 8], strides = [1, 1]} : vector<8x96xf32> to vector<8x8xf32>
    %48 = arith.truncf %47 : vector<8x8xf32> to vector<8x8xbf16>
    %cst_24 = arith.constant dense<0.000000e+00> : vector<8x8xf32>
    %49 = tpu.matmul %44, %46, %cst_24 {dimension_numbers = #tpu.dot_dimension_numbers<[1], [1], [0], [0], [0, 0, 1, 0], [], []>} : vector<8x8xbf16>, vector<8x8xbf16>, vector<8x8xf32> -> vector<8x8xf32>
    %cst_25 = arith.constant dense<0xFF800000> : vector<8xf32>
    %50 = vector.multi_reduction <maximumf>, %49, %cst_25 [1] : vector<8x8xf32> to vector<8xf32>
    %51 = vector.shape_cast %50 : vector<8xf32> to vector<8x1xf32>
    %52 = vector.broadcast %51 : vector<8x1xf32> to vector<8x8xf32>
    %53 = arith.subf %49, %52 : vector<8x8xf32>
    %54 = math.exp %53 : vector<8x8xf32>
    %cst_26 = arith.constant dense<0.000000e+00> : vector<8xf32>
    %55 = vector.multi_reduction <add>, %54, %cst_26 [1] : vector<8x8xf32> to vector<8xf32>
    %56 = vector.shape_cast %55 : vector<8xf32> to vector<8x1xf32>
    %57 = arith.truncf %54 : vector<8x8xf32> to vector<8x8xbf16>
    %cst_27 = arith.constant dense<0.000000e+00> : vector<8x8xf32>
    %58 = tpu.matmul %57, %48, %cst_27 {dimension_numbers = #tpu.dot_dimension_numbers<[1], [0], [0], [1], [0, 0, 1, 1], [], []>} : vector<8x8xbf16>, vector<8x8xbf16>, vector<8x8xf32> -> vector<8x8xf32>
    %59 = tpu.reciprocal %56 {approx = true} : vector<8x1xf32> -> vector<8x1xf32>
    %60 = vector.broadcast %59 : vector<8x1xf32> to vector<8x8xf32>
    %61 = arith.mulf %58, %60 : vector<8x8xf32>
    %62 = arith.truncf %61 : vector<8x8xf32> to vector<8x8xbf16>
    %63 = vector.extract_strided_slice %40 {offsets = [0, 0], sizes = [8, 32], strides = [1, 1]} : vector<32x32xbf16> to vector<8x32xbf16>
    %cst_28 = arith.constant dense<0.000000e+00> : vector<8x32xf32>
    %64 = tpu.matmul %62, %63, %cst_28 {dimension_numbers = #tpu.dot_dimension_numbers<[1], [0], [0], [1], [0, 0, 1, 1], [], []>} : vector<8x8xbf16>, vector<8x32xbf16>, vector<8x32xf32> -> vector<8x32xf32>
    %65 = arith.addf %42, %64 : vector<8x32xf32>
    %66 = vector.extract_strided_slice %41 {offsets = [0, 8], sizes = [8, 8], strides = [1, 1]} : vector<8x96xf32> to vector<8x8xf32>
    %67 = arith.truncf %66 : vector<8x8xf32> to vector<8x8xbf16>
    %68 = vector.extract_strided_slice %41 {offsets = [0, 40], sizes = [8, 8], strides = [1, 1]} : vector<8x96xf32> to vector<8x8xf32>
    %69 = arith.truncf %68 : vector<8x8xf32> to vector<8x8xbf16>
    %70 = vector.extract_strided_slice %41 {offsets = [0, 72], sizes = [8, 8], strides = [1, 1]} : vector<8x96xf32> to vector<8x8xf32>
    %71 = arith.truncf %70 : vector<8x8xf32> to vector<8x8xbf16>
    %cst_29 = arith.constant dense<0.000000e+00> : vector<8x8xf32>
    %72 = tpu.matmul %67, %69, %cst_29 {dimension_numbers = #tpu.dot_dimension_numbers<[1], [1], [0], [0], [0, 0, 1, 0], [], []>} : vector<8x8xbf16>, vector<8x8xbf16>, vector<8x8xf32> -> vector<8x8xf32>
    %cst_30 = arith.constant dense<0xFF800000> : vector<8xf32>
    %73 = vector.multi_reduction <maximumf>, %72, %cst_30 [1] : vector<8x8xf32> to vector<8xf32>
    %74 = vector.shape_cast %73 : vector<8xf32> to vector<8x1xf32>
    %75 = vector.broadcast %74 : vector<8x1xf32> to vector<8x8xf32>
    %76 = arith.subf %72, %75 : vector<8x8xf32>
    %77 = math.exp %76 : vector<8x8xf32>
    %cst_31 = arith.constant dense<0.000000e+00> : vector<8xf32>
    %78 = vector.multi_reduction <add>, %77, %cst_31 [1] : vector<8x8xf32> to vector<8xf32>
    %79 = vector.shape_cast %78 : vector<8xf32> to vector<8x1xf32>
    %80 = arith.truncf %77 : vector<8x8xf32> to vector<8x8xbf16>
    %cst_32 = arith.constant dense<0.000000e+00> : vector<8x8xf32>
    %81 = tpu.matmul %80, %71, %cst_32 {dimension_numbers = #tpu.dot_dimension_numbers<[1], [0], [0], [1], [0, 0, 1, 1], [], []>} : vector<8x8xbf16>, vector<8x8xbf16>, vector<8x8xf32> -> vector<8x8xf32>
    %82 = tpu.reciprocal %79 {approx = true} : vector<8x1xf32> -> vector<8x1xf32>
    %83 = vector.broadcast %82 : vector<8x1xf32> to vector<8x8xf32>
    %84 = arith.mulf %81, %83 : vector<8x8xf32>
    %85 = arith.truncf %84 : vector<8x8xf32> to vector<8x8xbf16>
    %86 = vector.extract_strided_slice %40 {offsets = [8, 0], sizes = [8, 32], strides = [1, 1]} : vector<32x32xbf16> to vector<8x32xbf16>
    %cst_33 = arith.constant dense<0.000000e+00> : vector<8x32xf32>
    %87 = tpu.matmul %85, %86, %cst_33 {dimension_numbers = #tpu.dot_dimension_numbers<[1], [0], [0], [1], [0, 0, 1, 1], [], []>} : vector<8x8xbf16>, vector<8x32xbf16>, vector<8x32xf32> -> vector<8x32xf32>
    %88 = arith.addf %65, %87 : vector<8x32xf32>
    %89 = vector.extract_strided_slice %41 {offsets = [0, 16], sizes = [8, 8], strides = [1, 1]} : vector<8x96xf32> to vector<8x8xf32>
    %90 = arith.truncf %89 : vector<8x8xf32> to vector<8x8xbf16>
    %91 = vector.extract_strided_slice %41 {offsets = [0, 48], sizes = [8, 8], strides = [1, 1]} : vector<8x96xf32> to vector<8x8xf32>
    %92 = arith.truncf %91 : vector<8x8xf32> to vector<8x8xbf16>
    %93 = vector.extract_strided_slice %41 {offsets = [0, 80], sizes = [8, 8], strides = [1, 1]} : vector<8x96xf32> to vector<8x8xf32>
    %94 = arith.truncf %93 : vector<8x8xf32> to vector<8x8xbf16>
    %cst_34 = arith.constant dense<0.000000e+00> : vector<8x8xf32>
    %95 = tpu.matmul %90, %92, %cst_34 {dimension_numbers = #tpu.dot_dimension_numbers<[1], [1], [0], [0], [0, 0, 1, 0], [], []>} : vector<8x8xbf16>, vector<8x8xbf16>, vector<8x8xf32> -> vector<8x8xf32>
    %cst_35 = arith.constant dense<0xFF800000> : vector<8xf32>
    %96 = vector.multi_reduction <maximumf>, %95, %cst_35 [1] : vector<8x8xf32> to vector<8xf32>
    %97 = vector.shape_cast %96 : vector<8xf32> to vector<8x1xf32>
    %98 = vector.broadcast %97 : vector<8x1xf32> to vector<8x8xf32>
    %99 = arith.subf %95, %98 : vector<8x8xf32>
    %100 = math.exp %99 : vector<8x8xf32>
    %cst_36 = arith.constant dense<0.000000e+00> : vector<8xf32>
    %101 = vector.multi_reduction <add>, %100, %cst_36 [1] : vector<8x8xf32> to vector<8xf32>
    %102 = vector.shape_cast %101 : vector<8xf32> to vector<8x1xf32>
    %103 = arith.truncf %100 : vector<8x8xf32> to vector<8x8xbf16>
    %cst_37 = arith.constant dense<0.000000e+00> : vector<8x8xf32>
    %104 = tpu.matmul %103, %94, %cst_37 {dimension_numbers = #tpu.dot_dimension_numbers<[1], [0], [0], [1], [0, 0, 1, 1], [], []>} : vector<8x8xbf16>, vector<8x8xbf16>, vector<8x8xf32> -> vector<8x8xf32>
    %105 = tpu.reciprocal %102 {approx = true} : vector<8x1xf32> -> vector<8x1xf32>
    %106 = vector.broadcast %105 : vector<8x1xf32> to vector<8x8xf32>
    %107 = arith.mulf %104, %106 : vector<8x8xf32>
    %108 = arith.truncf %107 : vector<8x8xf32> to vector<8x8xbf16>
    %109 = vector.extract_strided_slice %40 {offsets = [16, 0], sizes = [8, 32], strides = [1, 1]} : vector<32x32xbf16> to vector<8x32xbf16>
    %cst_38 = arith.constant dense<0.000000e+00> : vector<8x32xf32>
    %110 = tpu.matmul %108, %109, %cst_38 {dimension_numbers = #tpu.dot_dimension_numbers<[1], [0], [0], [1], [0, 0, 1, 1], [], []>} : vector<8x8xbf16>, vector<8x32xbf16>, vector<8x32xf32> -> vector<8x32xf32>
    %111 = arith.addf %88, %110 : vector<8x32xf32>
    %112 = vector.extract_strided_slice %41 {offsets = [0, 24], sizes = [8, 8], strides = [1, 1]} : vector<8x96xf32> to vector<8x8xf32>
    %113 = arith.truncf %112 : vector<8x8xf32> to vector<8x8xbf16>
    %114 = vector.extract_strided_slice %41 {offsets = [0, 56], sizes = [8, 8], strides = [1, 1]} : vector<8x96xf32> to vector<8x8xf32>
    %115 = arith.truncf %114 : vector<8x8xf32> to vector<8x8xbf16>
    %116 = vector.extract_strided_slice %41 {offsets = [0, 88], sizes = [8, 8], strides = [1, 1]} : vector<8x96xf32> to vector<8x8xf32>
    %117 = arith.truncf %116 : vector<8x8xf32> to vector<8x8xbf16>
    %cst_39 = arith.constant dense<0.000000e+00> : vector<8x8xf32>
    %118 = tpu.matmul %113, %115, %cst_39 {dimension_numbers = #tpu.dot_dimension_numbers<[1], [1], [0], [0], [0, 0, 1, 0], [], []>} : vector<8x8xbf16>, vector<8x8xbf16>, vector<8x8xf32> -> vector<8x8xf32>
    %cst_40 = arith.constant dense<0xFF800000> : vector<8xf32>
    %119 = vector.multi_reduction <maximumf>, %118, %cst_40 [1] : vector<8x8xf32> to vector<8xf32>
    %120 = vector.shape_cast %119 : vector<8xf32> to vector<8x1xf32>
    %121 = vector.broadcast %120 : vector<8x1xf32> to vector<8x8xf32>
    %122 = arith.subf %118, %121 : vector<8x8xf32>
    %123 = math.exp %122 : vector<8x8xf32>
    %cst_41 = arith.constant dense<0.000000e+00> : vector<8xf32>
    %124 = vector.multi_reduction <add>, %123, %cst_41 [1] : vector<8x8xf32> to vector<8xf32>
    %125 = vector.shape_cast %124 : vector<8xf32> to vector<8x1xf32>
    %126 = arith.truncf %123 : vector<8x8xf32> to vector<8x8xbf16>
    %cst_42 = arith.constant dense<0.000000e+00> : vector<8x8xf32>
    %127 = tpu.matmul %126, %117, %cst_42 {dimension_numbers = #tpu.dot_dimension_numbers<[1], [0], [0], [1], [0, 0, 1, 1], [], []>} : vector<8x8xbf16>, vector<8x8xbf16>, vector<8x8xf32> -> vector<8x8xf32>
    %128 = tpu.reciprocal %125 {approx = true} : vector<8x1xf32> -> vector<8x1xf32>
    %129 = vector.broadcast %128 : vector<8x1xf32> to vector<8x8xf32>
    %130 = arith.mulf %127, %129 : vector<8x8xf32>
    %131 = arith.truncf %130 : vector<8x8xf32> to vector<8x8xbf16>
    %132 = vector.extract_strided_slice %40 {offsets = [24, 0], sizes = [8, 32], strides = [1, 1]} : vector<32x32xbf16> to vector<8x32xbf16>
    %cst_43 = arith.constant dense<0.000000e+00> : vector<8x32xf32>
    %133 = tpu.matmul %131, %132, %cst_43 {dimension_numbers = #tpu.dot_dimension_numbers<[1], [0], [0], [1], [0, 0, 1, 1], [], []>} : vector<8x8xbf16>, vector<8x32xbf16>, vector<8x32xf32> -> vector<8x32xf32>
    %134 = arith.addf %111, %133 : vector<8x32xf32>
    %135 = vector.extract_strided_slice %38 {offsets = [8, 0], sizes = [8, 96], strides = [1, 1]} : vector<16x96xf32> to vector<8x96xf32>
    %cst_44 = arith.constant 0.000000e+00 : f32
    %136 = vector.broadcast %cst_44 : f32 to vector<8x32xf32>
    %137 = vector.extract_strided_slice %135 {offsets = [0, 0], sizes = [8, 8], strides = [1, 1]} : vector<8x96xf32> to vector<8x8xf32>
    %138 = arith.truncf %137 : vector<8x8xf32> to vector<8x8xbf16>
    %139 = vector.extract_strided_slice %135 {offsets = [0, 32], sizes = [8, 8], strides = [1, 1]} : vector<8x96xf32> to vector<8x8xf32>
    %140 = arith.truncf %139 : vector<8x8xf32> to vector<8x8xbf16>
    %141 = vector.extract_strided_slice %135 {offsets = [0, 64], sizes = [8, 8], strides = [1, 1]} : vector<8x96xf32> to vector<8x8xf32>
    %142 = arith.truncf %141 : vector<8x8xf32> to vector<8x8xbf16>
    %cst_45 = arith.constant dense<0.000000e+00> : vector<8x8xf32>
    %143 = tpu.matmul %138, %140, %cst_45 {dimension_numbers = #tpu.dot_dimension_numbers<[1], [1], [0], [0], [0, 0, 1, 0], [], []>} : vector<8x8xbf16>, vector<8x8xbf16>, vector<8x8xf32> -> vector<8x8xf32>
    %cst_46 = arith.constant dense<0xFF800000> : vector<8xf32>
    %144 = vector.multi_reduction <maximumf>, %143, %cst_46 [1] : vector<8x8xf32> to vector<8xf32>
    %145 = vector.shape_cast %144 : vector<8xf32> to vector<8x1xf32>
    %146 = vector.broadcast %145 : vector<8x1xf32> to vector<8x8xf32>
    %147 = arith.subf %143, %146 : vector<8x8xf32>
    %148 = math.exp %147 : vector<8x8xf32>
    %cst_47 = arith.constant dense<0.000000e+00> : vector<8xf32>
    %149 = vector.multi_reduction <add>, %148, %cst_47 [1] : vector<8x8xf32> to vector<8xf32>
    %150 = vector.shape_cast %149 : vector<8xf32> to vector<8x1xf32>
    %151 = arith.truncf %148 : vector<8x8xf32> to vector<8x8xbf16>
    %cst_48 = arith.constant dense<0.000000e+00> : vector<8x8xf32>
    %152 = tpu.matmul %151, %142, %cst_48 {dimension_numbers = #tpu.dot_dimension_numbers<[1], [0], [0], [1], [0, 0, 1, 1], [], []>} : vector<8x8xbf16>, vector<8x8xbf16>, vector<8x8xf32> -> vector<8x8xf32>
    %153 = tpu.reciprocal %150 {approx = true} : vector<8x1xf32> -> vector<8x1xf32>
    %154 = vector.broadcast %153 : vector<8x1xf32> to vector<8x8xf32>
    %155 = arith.mulf %152, %154 : vector<8x8xf32>
    %156 = arith.truncf %155 : vector<8x8xf32> to vector<8x8xbf16>
    %157 = vector.extract_strided_slice %40 {offsets = [0, 0], sizes = [8, 32], strides = [1, 1]} : vector<32x32xbf16> to vector<8x32xbf16>
    %cst_49 = arith.constant dense<0.000000e+00> : vector<8x32xf32>
    %158 = tpu.matmul %156, %157, %cst_49 {dimension_numbers = #tpu.dot_dimension_numbers<[1], [0], [0], [1], [0, 0, 1, 1], [], []>} : vector<8x8xbf16>, vector<8x32xbf16>, vector<8x32xf32> -> vector<8x32xf32>
    %159 = arith.addf %136, %158 : vector<8x32xf32>
    %160 = vector.extract_strided_slice %135 {offsets = [0, 8], sizes = [8, 8], strides = [1, 1]} : vector<8x96xf32> to vector<8x8xf32>
    %161 = arith.truncf %160 : vector<8x8xf32> to vector<8x8xbf16>
    %162 = vector.extract_strided_slice %135 {offsets = [0, 40], sizes = [8, 8], strides = [1, 1]} : vector<8x96xf32> to vector<8x8xf32>
    %163 = arith.truncf %162 : vector<8x8xf32> to vector<8x8xbf16>
    %164 = vector.extract_strided_slice %135 {offsets = [0, 72], sizes = [8, 8], strides = [1, 1]} : vector<8x96xf32> to vector<8x8xf32>
    %165 = arith.truncf %164 : vector<8x8xf32> to vector<8x8xbf16>
    %cst_50 = arith.constant dense<0.000000e+00> : vector<8x8xf32>
    %166 = tpu.matmul %161, %163, %cst_50 {dimension_numbers = #tpu.dot_dimension_numbers<[1], [1], [0], [0], [0, 0, 1, 0], [], []>} : vector<8x8xbf16>, vector<8x8xbf16>, vector<8x8xf32> -> vector<8x8xf32>
    %cst_51 = arith.constant dense<0xFF800000> : vector<8xf32>
    %167 = vector.multi_reduction <maximumf>, %166, %cst_51 [1] : vector<8x8xf32> to vector<8xf32>
    %168 = vector.shape_cast %167 : vector<8xf32> to vector<8x1xf32>
    %169 = vector.broadcast %168 : vector<8x1xf32> to vector<8x8xf32>
    %170 = arith.subf %166, %169 : vector<8x8xf32>
    %171 = math.exp %170 : vector<8x8xf32>
    %cst_52 = arith.constant dense<0.000000e+00> : vector<8xf32>
    %172 = vector.multi_reduction <add>, %171, %cst_52 [1] : vector<8x8xf32> to vector<8xf32>
    %173 = vector.shape_cast %172 : vector<8xf32> to vector<8x1xf32>
    %174 = arith.truncf %171 : vector<8x8xf32> to vector<8x8xbf16>
    %cst_53 = arith.constant dense<0.000000e+00> : vector<8x8xf32>
    %175 = tpu.matmul %174, %165, %cst_53 {dimension_numbers = #tpu.dot_dimension_numbers<[1], [0], [0], [1], [0, 0, 1, 1], [], []>} : vector<8x8xbf16>, vector<8x8xbf16>, vector<8x8xf32> -> vector<8x8xf32>
    %176 = tpu.reciprocal %173 {approx = true} : vector<8x1xf32> -> vector<8x1xf32>
    %177 = vector.broadcast %176 : vector<8x1xf32> to vector<8x8xf32>
    %178 = arith.mulf %175, %177 : vector<8x8xf32>
    %179 = arith.truncf %178 : vector<8x8xf32> to vector<8x8xbf16>
    %180 = vector.extract_strided_slice %40 {offsets = [8, 0], sizes = [8, 32], strides = [1, 1]} : vector<32x32xbf16> to vector<8x32xbf16>
    %cst_54 = arith.constant dense<0.000000e+00> : vector<8x32xf32>
    %181 = tpu.matmul %179, %180, %cst_54 {dimension_numbers = #tpu.dot_dimension_numbers<[1], [0], [0], [1], [0, 0, 1, 1], [], []>} : vector<8x8xbf16>, vector<8x32xbf16>, vector<8x32xf32> -> vector<8x32xf32>
    %182 = arith.addf %159, %181 : vector<8x32xf32>
    %183 = vector.extract_strided_slice %135 {offsets = [0, 16], sizes = [8, 8], strides = [1, 1]} : vector<8x96xf32> to vector<8x8xf32>
    %184 = arith.truncf %183 : vector<8x8xf32> to vector<8x8xbf16>
    %185 = vector.extract_strided_slice %135 {offsets = [0, 48], sizes = [8, 8], strides = [1, 1]} : vector<8x96xf32> to vector<8x8xf32>
    %186 = arith.truncf %185 : vector<8x8xf32> to vector<8x8xbf16>
    %187 = vector.extract_strided_slice %135 {offsets = [0, 80], sizes = [8, 8], strides = [1, 1]} : vector<8x96xf32> to vector<8x8xf32>
    %188 = arith.truncf %187 : vector<8x8xf32> to vector<8x8xbf16>
    %cst_55 = arith.constant dense<0.000000e+00> : vector<8x8xf32>
    %189 = tpu.matmul %184, %186, %cst_55 {dimension_numbers = #tpu.dot_dimension_numbers<[1], [1], [0], [0], [0, 0, 1, 0], [], []>} : vector<8x8xbf16>, vector<8x8xbf16>, vector<8x8xf32> -> vector<8x8xf32>
    %cst_56 = arith.constant dense<0xFF800000> : vector<8xf32>
    %190 = vector.multi_reduction <maximumf>, %189, %cst_56 [1] : vector<8x8xf32> to vector<8xf32>
    %191 = vector.shape_cast %190 : vector<8xf32> to vector<8x1xf32>
    %192 = vector.broadcast %191 : vector<8x1xf32> to vector<8x8xf32>
    %193 = arith.subf %189, %192 : vector<8x8xf32>
    %194 = math.exp %193 : vector<8x8xf32>
    %cst_57 = arith.constant dense<0.000000e+00> : vector<8xf32>
    %195 = vector.multi_reduction <add>, %194, %cst_57 [1] : vector<8x8xf32> to vector<8xf32>
    %196 = vector.shape_cast %195 : vector<8xf32> to vector<8x1xf32>
    %197 = arith.truncf %194 : vector<8x8xf32> to vector<8x8xbf16>
    %cst_58 = arith.constant dense<0.000000e+00> : vector<8x8xf32>
    %198 = tpu.matmul %197, %188, %cst_58 {dimension_numbers = #tpu.dot_dimension_numbers<[1], [0], [0], [1], [0, 0, 1, 1], [], []>} : vector<8x8xbf16>, vector<8x8xbf16>, vector<8x8xf32> -> vector<8x8xf32>
    %199 = tpu.reciprocal %196 {approx = true} : vector<8x1xf32> -> vector<8x1xf32>
    %200 = vector.broadcast %199 : vector<8x1xf32> to vector<8x8xf32>
    %201 = arith.mulf %198, %200 : vector<8x8xf32>
    %202 = arith.truncf %201 : vector<8x8xf32> to vector<8x8xbf16>
    %203 = vector.extract_strided_slice %40 {offsets = [16, 0], sizes = [8, 32], strides = [1, 1]} : vector<32x32xbf16> to vector<8x32xbf16>
    %cst_59 = arith.constant dense<0.000000e+00> : vector<8x32xf32>
    %204 = tpu.matmul %202, %203, %cst_59 {dimension_numbers = #tpu.dot_dimension_numbers<[1], [0], [0], [1], [0, 0, 1, 1], [], []>} : vector<8x8xbf16>, vector<8x32xbf16>, vector<8x32xf32> -> vector<8x32xf32>
    %205 = arith.addf %182, %204 : vector<8x32xf32>
    %206 = vector.extract_strided_slice %135 {offsets = [0, 24], sizes = [8, 8], strides = [1, 1]} : vector<8x96xf32> to vector<8x8xf32>
    %207 = arith.truncf %206 : vector<8x8xf32> to vector<8x8xbf16>
    %208 = vector.extract_strided_slice %135 {offsets = [0, 56], sizes = [8, 8], strides = [1, 1]} : vector<8x96xf32> to vector<8x8xf32>
    %209 = arith.truncf %208 : vector<8x8xf32> to vector<8x8xbf16>
    %210 = vector.extract_strided_slice %135 {offsets = [0, 88], sizes = [8, 8], strides = [1, 1]} : vector<8x96xf32> to vector<8x8xf32>
    %211 = arith.truncf %210 : vector<8x8xf32> to vector<8x8xbf16>
    %cst_60 = arith.constant dense<0.000000e+00> : vector<8x8xf32>
    %212 = tpu.matmul %207, %209, %cst_60 {dimension_numbers = #tpu.dot_dimension_numbers<[1], [1], [0], [0], [0, 0, 1, 0], [], []>} : vector<8x8xbf16>, vector<8x8xbf16>, vector<8x8xf32> -> vector<8x8xf32>
    %cst_61 = arith.constant dense<0xFF800000> : vector<8xf32>
    %213 = vector.multi_reduction <maximumf>, %212, %cst_61 [1] : vector<8x8xf32> to vector<8xf32>
    %214 = vector.shape_cast %213 : vector<8xf32> to vector<8x1xf32>
    %215 = vector.broadcast %214 : vector<8x1xf32> to vector<8x8xf32>
    %216 = arith.subf %212, %215 : vector<8x8xf32>
    %217 = math.exp %216 : vector<8x8xf32>
    %cst_62 = arith.constant dense<0.000000e+00> : vector<8xf32>
    %218 = vector.multi_reduction <add>, %217, %cst_62 [1] : vector<8x8xf32> to vector<8xf32>
    %219 = vector.shape_cast %218 : vector<8xf32> to vector<8x1xf32>
    %220 = arith.truncf %217 : vector<8x8xf32> to vector<8x8xbf16>
    %cst_63 = arith.constant dense<0.000000e+00> : vector<8x8xf32>
    %221 = tpu.matmul %220, %211, %cst_63 {dimension_numbers = #tpu.dot_dimension_numbers<[1], [0], [0], [1], [0, 0, 1, 1], [], []>} : vector<8x8xbf16>, vector<8x8xbf16>, vector<8x8xf32> -> vector<8x8xf32>
    %222 = tpu.reciprocal %219 {approx = true} : vector<8x1xf32> -> vector<8x1xf32>
    %223 = vector.broadcast %222 : vector<8x1xf32> to vector<8x8xf32>
    %224 = arith.mulf %221, %223 : vector<8x8xf32>
    %225 = arith.truncf %224 : vector<8x8xf32> to vector<8x8xbf16>
    %226 = vector.extract_strided_slice %40 {offsets = [24, 0], sizes = [8, 32], strides = [1, 1]} : vector<32x32xbf16> to vector<8x32xbf16>
    %cst_64 = arith.constant dense<0.000000e+00> : vector<8x32xf32>
    %227 = tpu.matmul %225, %226, %cst_64 {dimension_numbers = #tpu.dot_dimension_numbers<[1], [0], [0], [1], [0, 0, 1, 1], [], []>} : vector<8x8xbf16>, vector<8x32xbf16>, vector<8x32xf32> -> vector<8x32xf32>
    %228 = arith.addf %205, %227 : vector<8x32xf32>
    %229 = tpu.concatenate %134, %228 in 0 : vector<8x32xf32>, vector<8x32xf32> -> vector<16x32xf32>
    %230 = arith.addf %4, %229 : vector<16x32xf32>
    %c0_65 = arith.constant 0 : index
    %c0_66 = arith.constant 0 : index
    %c0_67 = arith.constant 0 : index
    %231 = vector.load %arg8[%c0_65, %c0_66, %c0_67] : memref<1x1x32xf32, #tpu.memory_space<vmem>>, vector<1x1x32xf32>
    %232 = vector.shape_cast %231 : vector<1x1x32xf32> to vector<1x32xf32>
    %233 = vector.broadcast %232 : vector<1x32xf32> to vector<16x32xf32>
    %234 = arith.addf %230, %233 : vector<16x32xf32>
    %c0_68 = arith.constant 0 : index
    %c0_69 = arith.constant 0 : index
    %c0_70 = arith.constant 0 : index
    %235 = vector.load %arg9[%c0_68, %c0_69, %c0_70] : memref<1x1x32xf32, #tpu.memory_space<vmem>>, vector<1x1x32xf32>
    %236 = vector.shape_cast %235 : vector<1x1x32xf32> to vector<1x32xf32>
    %c0_71 = arith.constant 0 : index
    %c0_72 = arith.constant 0 : index
    %c0_73 = arith.constant 0 : index
    %237 = vector.load %arg10[%c0_71, %c0_72, %c0_73] : memref<1x1x32xf32, #tpu.memory_space<vmem>>, vector<1x1x32xf32>
    %238 = vector.shape_cast %237 : vector<1x1x32xf32> to vector<1x32xf32>
    %c0_74 = arith.constant 0 : index
    %c0_75 = arith.constant 0 : index
    %c0_76 = arith.constant 0 : index
    %239 = vector.load %arg11[%c0_74, %c0_75, %c0_76] : memref<1x32x64xbf16, #tpu.memory_space<vmem>>, vector<1x32x64xbf16>
    %240 = vector.shape_cast %239 : vector<1x32x64xbf16> to vector<32x64xbf16>
    %c0_77 = arith.constant 0 : index
    %c0_78 = arith.constant 0 : index
    %c0_79 = arith.constant 0 : index
    %241 = vector.load %arg12[%c0_77, %c0_78, %c0_79] : memref<1x1x64xf32, #tpu.memory_space<vmem>>, vector<1x1x64xf32>
    %242 = vector.shape_cast %241 : vector<1x1x64xf32> to vector<1x64xf32>
    %c0_80 = arith.constant 0 : index
    %c0_81 = arith.constant 0 : index
    %c0_82 = arith.constant 0 : index
    %243 = vector.load %arg13[%c0_80, %c0_81, %c0_82] : memref<1x64x32xbf16, #tpu.memory_space<vmem>>, vector<1x64x32xbf16>
    %244 = vector.shape_cast %243 : vector<1x64x32xbf16> to vector<64x32xbf16>
    %c0_83 = arith.constant 0 : index
    %c0_84 = arith.constant 0 : index
    %c0_85 = arith.constant 0 : index
    %245 = vector.load %arg14[%c0_83, %c0_84, %c0_85] : memref<1x1x32xf32, #tpu.memory_space<vmem>>, vector<1x1x32xf32>
    %246 = vector.shape_cast %245 : vector<1x1x32xf32> to vector<1x32xf32>
    %247 = vector.extract_strided_slice %234 {offsets = [0, 0], sizes = [8, 32], strides = [1, 1]} : vector<16x32xf32> to vector<8x32xf32>
    %cst_86 = arith.constant dense<0.000000e+00> : vector<8xf32>
    %248 = vector.multi_reduction <add>, %247, %cst_86 [1] : vector<8x32xf32> to vector<8xf32>
    %249 = vector.shape_cast %248 : vector<8xf32> to vector<8x1xf32>
    %cst_87 = arith.constant 3.200000e+01 : f32
    %250 = vector.broadcast %cst_87 : f32 to vector<8x1xf32>
    %251 = arith.divf %249, %250 : vector<8x1xf32>
    %252 = vector.broadcast %251 : vector<8x1xf32> to vector<8x32xf32>
    %253 = arith.subf %247, %252 : vector<8x32xf32>
    %254 = arith.mulf %253, %253 : vector<8x32xf32>
    %cst_88 = arith.constant dense<0.000000e+00> : vector<8xf32>
    %255 = vector.multi_reduction <add>, %254, %cst_88 [1] : vector<8x32xf32> to vector<8xf32>
    %256 = vector.shape_cast %255 : vector<8xf32> to vector<8x1xf32>
    %cst_89 = arith.constant 3.200000e+01 : f32
    %257 = vector.broadcast %cst_89 : f32 to vector<8x1xf32>
    %258 = arith.divf %256, %257 : vector<8x1xf32>
    %259 = vector.broadcast %251 : vector<8x1xf32> to vector<8x32xf32>
    %260 = arith.subf %247, %259 : vector<8x32xf32>
    %cst_90 = arith.constant 9.99999974E-6 : f32
    %261 = vector.broadcast %cst_90 : f32 to vector<8x1xf32>
    %262 = arith.addf %258, %261 : vector<8x1xf32>
    %263 = math.rsqrt %262 : vector<8x1xf32>
    %264 = vector.broadcast %263 : vector<8x1xf32> to vector<8x32xf32>
    %265 = arith.mulf %260, %264 : vector<8x32xf32>
    %266 = vector.broadcast %236 : vector<1x32xf32> to vector<8x32xf32>
    %267 = arith.mulf %265, %266 : vector<8x32xf32>
    %268 = vector.broadcast %238 : vector<1x32xf32> to vector<8x32xf32>
    %269 = arith.addf %267, %268 : vector<8x32xf32>
    %270 = arith.truncf %269 : vector<8x32xf32> to vector<8x32xbf16>
    %cst_91 = arith.constant dense<0.000000e+00> : vector<8x64xf32>
    %271 = tpu.matmul %270, %240, %cst_91 {dimension_numbers = #tpu.dot_dimension_numbers<[1], [0], [0], [1], [0, 0, 1, 1], [], []>} : vector<8x32xbf16>, vector<32x64xbf16>, vector<8x64xf32> -> vector<8x64xf32>
    %272 = vector.broadcast %242 : vector<1x64xf32> to vector<8x64xf32>
    %273 = arith.addf %271, %272 : vector<8x64xf32>
    %cst_92 = arith.constant 5.000000e-01 : f32
    %274 = vector.broadcast %cst_92 : f32 to vector<8x64xf32>
    %275 = arith.mulf %274, %273 : vector<8x64xf32>
    %cst_93 = arith.constant 4.471500e-02 : f32
    %276 = vector.broadcast %cst_93 : f32 to vector<8x64xf32>
    %277 = arith.mulf %276, %273 : vector<8x64xf32>
    %278 = arith.mulf %277, %273 : vector<8x64xf32>
    %279 = arith.mulf %278, %273 : vector<8x64xf32>
    %280 = arith.addf %273, %279 : vector<8x64xf32>
    %cst_94 = arith.constant 0.797884583 : f32
    %281 = vector.broadcast %cst_94 : f32 to vector<8x64xf32>
    %282 = arith.mulf %281, %280 : vector<8x64xf32>
    %283 = math.tanh %282 : vector<8x64xf32>
    %cst_95 = arith.constant 1.000000e+00 : f32
    %284 = vector.broadcast %cst_95 : f32 to vector<8x64xf32>
    %285 = arith.addf %284, %283 : vector<8x64xf32>
    %286 = arith.mulf %275, %285 : vector<8x64xf32>
    %287 = arith.truncf %286 : vector<8x64xf32> to vector<8x64xbf16>
    %cst_96 = arith.constant dense<0.000000e+00> : vector<8x32xf32>
    %288 = tpu.matmul %287, %244, %cst_96 {dimension_numbers = #tpu.dot_dimension_numbers<[1], [0], [0], [1], [0, 0, 1, 1], [], []>} : vector<8x64xbf16>, vector<64x32xbf16>, vector<8x32xf32> -> vector<8x32xf32>
    %289 = vector.broadcast %246 : vector<1x32xf32> to vector<8x32xf32>
    %290 = arith.addf %288, %289 : vector<8x32xf32>
    %291 = arith.addf %247, %290 : vector<8x32xf32>
    %292 = vector.extract_strided_slice %234 {offsets = [8, 0], sizes = [8, 32], strides = [1, 1]} : vector<16x32xf32> to vector<8x32xf32>
    %cst_97 = arith.constant dense<0.000000e+00> : vector<8xf32>
    %293 = vector.multi_reduction <add>, %292, %cst_97 [1] : vector<8x32xf32> to vector<8xf32>
    %294 = vector.shape_cast %293 : vector<8xf32> to vector<8x1xf32>
    %cst_98 = arith.constant 3.200000e+01 : f32
    %295 = vector.broadcast %cst_98 : f32 to vector<8x1xf32>
    %296 = arith.divf %294, %295 : vector<8x1xf32>
    %297 = vector.broadcast %296 : vector<8x1xf32> to vector<8x32xf32>
    %298 = arith.subf %292, %297 : vector<8x32xf32>
    %299 = arith.mulf %298, %298 : vector<8x32xf32>
    %cst_99 = arith.constant dense<0.000000e+00> : vector<8xf32>
    %300 = vector.multi_reduction <add>, %299, %cst_99 [1] : vector<8x32xf32> to vector<8xf32>
    %301 = vector.shape_cast %300 : vector<8xf32> to vector<8x1xf32>
    %cst_100 = arith.constant 3.200000e+01 : f32
    %302 = vector.broadcast %cst_100 : f32 to vector<8x1xf32>
    %303 = arith.divf %301, %302 : vector<8x1xf32>
    %304 = vector.broadcast %296 : vector<8x1xf32> to vector<8x32xf32>
    %305 = arith.subf %292, %304 : vector<8x32xf32>
    %cst_101 = arith.constant 9.99999974E-6 : f32
    %306 = vector.broadcast %cst_101 : f32 to vector<8x1xf32>
    %307 = arith.addf %303, %306 : vector<8x1xf32>
    %308 = math.rsqrt %307 : vector<8x1xf32>
    %309 = vector.broadcast %308 : vector<8x1xf32> to vector<8x32xf32>
    %310 = arith.mulf %305, %309 : vector<8x32xf32>
    %311 = vector.broadcast %236 : vector<1x32xf32> to vector<8x32xf32>
    %312 = arith.mulf %310, %311 : vector<8x32xf32>
    %313 = vector.broadcast %238 : vector<1x32xf32> to vector<8x32xf32>
    %314 = arith.addf %312, %313 : vector<8x32xf32>
    %315 = arith.truncf %314 : vector<8x32xf32> to vector<8x32xbf16>
    %cst_102 = arith.constant dense<0.000000e+00> : vector<8x64xf32>
    %316 = tpu.matmul %315, %240, %cst_102 {dimension_numbers = #tpu.dot_dimension_numbers<[1], [0], [0], [1], [0, 0, 1, 1], [], []>} : vector<8x32xbf16>, vector<32x64xbf16>, vector<8x64xf32> -> vector<8x64xf32>
    %317 = vector.broadcast %242 : vector<1x64xf32> to vector<8x64xf32>
    %318 = arith.addf %316, %317 : vector<8x64xf32>
    %cst_103 = arith.constant 5.000000e-01 : f32
    %319 = vector.broadcast %cst_103 : f32 to vector<8x64xf32>
    %320 = arith.mulf %319, %318 : vector<8x64xf32>
    %cst_104 = arith.constant 4.471500e-02 : f32
    %321 = vector.broadcast %cst_104 : f32 to vector<8x64xf32>
    %322 = arith.mulf %321, %318 : vector<8x64xf32>
    %323 = arith.mulf %322, %318 : vector<8x64xf32>
    %324 = arith.mulf %323, %318 : vector<8x64xf32>
    %325 = arith.addf %318, %324 : vector<8x64xf32>
    %cst_105 = arith.constant 0.797884583 : f32
    %326 = vector.broadcast %cst_105 : f32 to vector<8x64xf32>
    %327 = arith.mulf %326, %325 : vector<8x64xf32>
    %328 = math.tanh %327 : vector<8x64xf32>
    %cst_106 = arith.constant 1.000000e+00 : f32
    %329 = vector.broadcast %cst_106 : f32 to vector<8x64xf32>
    %330 = arith.addf %329, %328 : vector<8x64xf32>
    %331 = arith.mulf %320, %330 : vector<8x64xf32>
    %332 = arith.truncf %331 : vector<8x64xf32> to vector<8x64xbf16>
    %cst_107 = arith.constant dense<0.000000e+00> : vector<8x32xf32>
    %333 = tpu.matmul %332, %244, %cst_107 {dimension_numbers = #tpu.dot_dimension_numbers<[1], [0], [0], [1], [0, 0, 1, 1], [], []>} : vector<8x64xbf16>, vector<64x32xbf16>, vector<8x32xf32> -> vector<8x32xf32>
    %334 = vector.broadcast %246 : vector<1x32xf32> to vector<8x32xf32>
    %335 = arith.addf %333, %334 : vector<8x32xf32>
    %336 = arith.addf %292, %335 : vector<8x32xf32>
    %337 = tpu.concatenate %291, %336 in 0 : vector<8x32xf32>, vector<8x32xf32> -> vector<16x32xf32>
    %338 = vector.shape_cast %337 : vector<16x32xf32> to vector<2x8x32xf32>
    %c0_108 = arith.constant 0 : index
    %c0_109 = arith.constant 0 : index
    %c0_110 = arith.constant 0 : index
    %339 = vector.load %arg15[%c0_108, %c0_109, %c0_110] : memref<2x8x32xf32, #tpu.memory_space<vmem>>, vector<2x8x32xf32>
    tpu.vector_store %arg15[%c0_108, %c0_109, %c0_110], %338 {strides = array<i32>} : memref<2x8x32xf32, #tpu.memory_space<vmem>>, vector<2x8x32xf32>,
    return
  }
  func.func @transform_0(%arg0: i32, %arg1: i32) -> (i32, i32, i32) {
    %c0_i32 = arith.constant 0 : i32
    %c0_i32_0 = arith.constant 0 : i32
    %c0_i32_1 = arith.constant 0 : i32
    return %arg0, %c0_i32, %c0_i32_0 : i32, i32, i32
  }
  func.func @transform_1(%arg0: i32, %arg1: i32) -> (i32, i32, i32) {
    %c0_i32 = arith.constant 0 : i32
    %c0_i32_0 = arith.constant 0 : i32
    %c0_i32_1 = arith.constant 0 : i32
    return %arg1, %c0_i32, %c0_i32_0 : i32, i32, i32
  }
  func.func @transform_2(%arg0: i32, %arg1: i32) -> (i32, i32, i32) {
    %c0_i32 = arith.constant 0 : i32
    %c0_i32_0 = arith.constant 0 : i32
    %c0_i32_1 = arith.constant 0 : i32
    return %arg1, %c0_i32, %c0_i32_0 : i32, i32, i32
  }
  func.func @transform_3(%arg0: i32, %arg1: i32) -> (i32, i32, i32) {
    %c0_i32 = arith.constant 0 : i32
    %c0_i32_0 = arith.constant 0 : i32
    %c0_i32_1 = arith.constant 0 : i32
    return %arg1, %c0_i32, %c0_i32_0 : i32, i32, i32
  }
  func.func @transform_4(%arg0: i32, %arg1: i32) -> (i32, i32, i32) {
    %c0_i32 = arith.constant 0 : i32
    %c0_i32_0 = arith.constant 0 : i32
    %c0_i32_1 = arith.constant 0 : i32
    return %arg1, %c0_i32, %c0_i32_0 : i32, i32, i32
  }
  func.func @transform_5(%arg0: i32, %arg1: i32) -> (i32, i32, i32) {
    %c0_i32 = arith.constant 0 : i32
    %c0_i32_0 = arith.constant 0 : i32
    %c0_i32_1 = arith.constant 0 : i32
    return %arg1, %c0_i32, %c0_i32_0 : i32, i32, i32
  }
  func.func @transform_6(%arg0: i32, %arg1: i32) -> (i32, i32, i32) {
    %c0_i32 = arith.constant 0 : i32
    %c0_i32_0 = arith.constant 0 : i32
    %c0_i32_1 = arith.constant 0 : i32
    return %arg1, %c0_i32, %c0_i32_0 : i32, i32, i32
  }
  func.func @transform_7(%arg0: i32, %arg1: i32) -> (i32, i32, i32) {
    %c0_i32 = arith.constant 0 : i32
    %c0_i32_0 = arith.constant 0 : i32
    %c0_i32_1 = arith.constant 0 : i32
    return %arg1, %c0_i32, %c0_i32_0 : i32, i32, i32
  }
  func.func @transform_8(%arg0: i32, %arg1: i32) -> (i32, i32, i32) {
    %c0_i32 = arith.constant 0 : i32
    %c0_i32_0 = arith.constant 0 : i32
    %c0_i32_1 = arith.constant 0 : i32
    return %arg1, %c0_i32, %c0_i32_0 : i32, i32, i32
  }
  func.func @transform_9(%arg0: i32, %arg1: i32) -> (i32, i32, i32) {
    %c0_i32 = arith.constant 0 : i32
    %c0_i32_0 = arith.constant 0 : i32
    %c0_i32_1 = arith.constant 0 : i32
    return %arg1, %c0_i32, %c0_i32_0 : i32, i32, i32
  }
  func.func @transform_10(%arg0: i32, %arg1: i32) -> (i32, i32, i32) {
    %c0_i32 = arith.constant 0 : i32
    %c0_i32_0 = arith.constant 0 : i32
    %c0_i32_1 = arith.constant 0 : i32
    return %arg1, %c0_i32, %c0_i32_0 : i32, i32, i32
  }
  func.func @transform_11(%arg0: i32, %arg1: i32) -> (i32, i32, i32) {
    %c0_i32 = arith.constant 0 : i32
    %c0_i32_0 = arith.constant 0 : i32
    %c0_i32_1 = arith.constant 0 : i32
    return %arg1, %c0_i32, %c0_i32_0 : i32, i32, i32
  }
  func.func @transform_12(%arg0: i32, %arg1: i32) -> (i32, i32, i32) {
    %c0_i32 = arith.constant 0 : i32
    %c0_i32_0 = arith.constant 0 : i32
    %c0_i32_1 = arith.constant 0 : i32
    return %arg1, %c0_i32, %c0_i32_0 : i32, i32, i32
  }
  func.func @transform_13(%arg0: i32, %arg1: i32) -> (i32, i32, i32) {
    %c0_i32 = arith.constant 0 : i32
    %c0_i32_0 = arith.constant 0 : i32
    %c0_i32_1 = arith.constant 0 : i32
    return %arg0, %c0_i32, %c0_i32_0 : i32, i32, i32
  }
}

</mosaic_0001>

<bundles_post_ra>
// kernel: tpu_custom_call.1
= control target key start
LH: loop header
LB: loop body
LE: loop exit
PB: predicated region body
PF: predicated region fallthrough
CT: control target
= control target key end

     0   :  { %s4014_s0 = inlined_call_operand.hbm [shape: f32[2,8,32], index: 0, kind: input, shape index: {}]   ;;  %s4015_s1 = inlined_call_operand.vmem [shape: f32[2,1,32], index: 1, kind: input, shape index: {}]   ;;  %s4016_s2 = inlined_call_operand.vmem [shape: f32[2,1,32], index: 2, kind: input, shape index: {}]   ;;  %s4017_s3 = inlined_call_operand.vmem [shape: bf16[2,32,96], index: 3, kind: input, shape index: {}]   ;;  %s4018_s4 = inlined_call_operand.vmem [shape: f32[2,1,96], index: 4, kind: input, shape index: {}]   ;;  %s4019_s5 = inlined_call_operand.vmem [shape: bf16[2,32,32], index: 5, kind: input, shape index: {}]   ;;  %s4020_s6 = inlined_call_operand.vmem [shape: f32[2,1,32], index: 6, kind: input, shape index: {}]   ;;  %s4021_s7 = inlined_call_operand.hbm [shape: f32[2,1,32], index: 7, kind: input, shape index: {}]   ;;  %s4022_s8 = inlined_call_operand.hbm [shape: f32[2,1,32], index: 8, kind: input, shape index: {}]   ;;  %s4023_s9 = inlined_call_operand.vmem [shape: bf16[2,32,64], index: 9, kind: input, shape index: {}]   ;;  %s4024_s10 = inlined_call_operand.hbm [shape: f32[2,1,64], index: 10, kind: input, shape index: {}]   ;;  %s4025_s11 = inlined_call_operand.vmem [shape: bf16[2,64,32], index: 11, kind: input, shape index: {}]   ;;  %s4026_s12 = inlined_call_operand.vmem [shape: f32[2,1,32], index: 12, kind: input, shape index: {}]   ;;  %s4027_s13 = inlined_call_operand.hbm [shape: f32[2,8,32], index: 13, kind: output, shape index: {}]  }
   0x1   :  { %4040 = sst [smem:[#allocation20_spill]] %s4014_s0 }
   0x2   :  { %4041 = sst [smem:[#allocation21_spill]] %s4017_s3 }
   0x3   :  { %4042 = sst [smem:[#allocation22_spill]] %s4019_s5 }
   0x4   :  { %4043 = sst [smem:[#allocation23_spill]] %s4020_s6 }
   0x5   :  { %4044 = sst [smem:[#allocation24_spill]] %s4021_s7 }
   0x6   :  { %4045 = sst [smem:[#allocation25_spill]] %s4022_s8 }
   0x7   :  { %4046 = sst [smem:[#allocation26_spill]] %s4023_s9 }
   0x8   :  { %4047 = sst [smem:[#allocation27_spill]] %s4025_s11 }
   0x9   :  { %4048 = sst [smem:[#allocation28_spill]] %s4026_s12 }
   0xa   :  { %4049 = sst [smem:[#allocation29_spill]] %s4027_s13 }
   0xb   :  { %18 = vsyncpa [#allocation3], 0 }
   0xc   :  { %19 = vsyncpa [#allocation6], 0 }
   0xd   :  { %21 = vsyncpa [#allocation6 + $0x1], 0 }
   0xe   :  { %22 = vsyncpa [#allocation9], 0 }
   0xf   :  { %24 = vsyncpa [#allocation9 + $0x1], 0 }
  0x10   :  { %25 = vsyncpa [#allocation4], 0  ;;  %s3390_s25 = smov 0   ;;  %s3392_s26 = smov 0  }
  0x11   :  { %s3394_s27 = smov 0   ;;  %s3396_s28 = smov 0  }
  0x12   :  { %s3398_s29 = smov 0   ;;  %s3400_s30 = smov 0  }
  0x13 LB: > { %4050 = sst [smem:[#allocation15_spill]] %s3284_s27  ;;  %s40_s14 = sadd.s32 1, %s3292_s29  ;;  %s3296_s30 = sphi %s3400_s30, %s31_s30   ;;  %s3292_s29 = sphi %s3398_s29, %s4089_s29   ;;  %s3288_s28 = sphi %s3396_s28, %s4088_s28   ;;  %s3284_s27 = sphi %s3394_s27, %s4087_s27   ;;  %s3280_s26 = sphi %s3392_s26, %s4091_s26   ;;  %s3276_s25 = sphi %s3390_s25, %s4090_s25  }
  0x14   : > { %4051 = sst [smem:[#allocation16_spill]] %s3292_s29  ;;  %s232_s15 = sadd.s32 1, %s3284_s27 }
  0x15   : > { %4052 = sst [smem:[#allocation17_spill]] %s3296_s30  ;;  %p41_p0 = scmp.ge.s32.totalorder %s40_s14, 2 }
  0x16   : > { %p239_p1 = scmp.ne.s32.totalorder %s3284_s27, %s3280_s26  ;;  %p240_p2 = scmp.eq.s32.totalorder %s3296_s30, 0 }
  0x17   : > { %s4093_s14 = smov (%p41_p0, %s40_s14), 0  ;;  %p2967_p4 = scmp.lt.s32.totalorder %s3296_s30, 2 }
  0x18   : > { %4053 = sst [smem:[#allocation18_spill]] %s4093_s14  ;;  %p241_p3 = por %p240_p2, %p239_p1 }
  0x19   : > { %s229_s16 = ssub.s32 %s3292_s29, %s4093_s14  ;;  %s481_s17 = sand.u32 1, %s3296_s30  }
  0x1a   : > { %p230_p5 = scmp.eq.s32.totalorder %s229_s16, 0  ;;  %s3432_s18 = sand.u32 1, %s3284_s27  }
  0x1b   : > { %s3435_s19 = sshll.u32 %s3292_s29, 4  ;;  %s4055_s7 = sld [smem:[#allocation24_spill]] }
  0x1c   : > { %s3438_s20 = scalar_select %p230_p5, %s3284_s27, %s232_s15  }
  0x1d   : > { %s484_s24 = scalar_lea.vmem [#allocation5], %s3432_s18  ;;  %p3447_p6 = pnand %p2967_p4, %p241_p3 }
  0x1e   : > { %4054 = sst [smem:[#allocation19_spill]] %s3438_s20  ;;  %s491_s14 = sshll.u32 %s484_s24, 4  ;;  %s3451_s14 = int_to_ptr.vmem [resolvable:$true] %s491_s14 }
  0x1f   : > { %s4056_s16 = scalar_select %p3447_p6, 1, 0 }
  0x20   : > { %s3453_s15 = scalar_lea.sflag [#allocation6], %s481_s17  ;;  %p3459_p8 = pneg %p3447_p6 }
  0x21   : > { %s3444_s23 = scalar_lea.hbm %s4055_s7, %s3435_s19  ;;  %s3095_s20 = scalar_lea.hbm %s4055_s7, 32 }
  0x22   : > { %s3090_s29 = scalar_lea.hbm %s3444_s23, 16  ;;  %p3096_p11 = scmp.lt.u32.totalorder %s3444_s23, %s4055_s7 }
  0x23   : > { %p3091_p7 = scmp.ne.s32.totalorder %s3444_s23, %s3090_s29  ;;  %p3097_p12 = scmp.lt.u32.totalorder %s3095_s20, %s3090_s29 }
  0x24   : > { %s4057_s21 = scalar_select %p3459_p8, 1, 0 }
  0x25   : > { %p3093_p9 = pnand %p3459_p8, %p3091_p7  ;;  %p3098_p13 = por %p3097_p12, %p3096_p11 }
  0x26   : > { %p3099_p0 = scmp.lt.u32.totalorder %s3090_s29, %s3444_s23 }
  0x27   : > { %p3094_p10 = pneg %p3093_p9 }
  0x28   : > { %p3100_p1 = por %p3099_p0, %p3098_p13 }
  0x2a   : > { %p3101_p2 = pnand %p3100_p1, %p3094_p10 }
  0x2c   : > { %3104 = shalt.err (!%p3101_p2)
}
  0x2d   : > { %s3105_s17 = scalar_lea.vmem %s3451_s14, 16  ;;  %s3298_s22 = smov [#allocation5]  }
  0x2e   : > { %p3106_p3 = scmp.ne.s32.totalorder %s3451_s14, %s3105_s17  ;;  %s3110_s24 = sshll.u32 %s3298_s22, 4  ;;  %s3111_s24 = int_to_ptr.vmem [resolvable:$false] %s3110_s24 }
  0x2f   : > { %s3112_s13 = scalar_lea.vmem %s3111_s24, 32  ;;  %p3113_p7 = scmp.lt.s32.totalorder %s3451_s14, %s3111_s24 }
  0x30   : > { %p3108_p4 = pnand %p3106_p3, %p3459_p8  ;;  %p3114_p9 = scmp.lt.s32.totalorder %s3112_s13, %s3105_s17 }
  0x32   : > { %p3109_p5 = pneg %p3108_p4  ;;  %p3115_p11 = por %p3114_p9, %p3113_p7 }
  0x34   : > { %p3116_p12 = pnand %p3115_p11, %p3109_p5 }
  0x36   : > { %3119 = shalt.err (!%p3116_p12)
}
  0x37   : > { %2959 = dma.hbm_to_vmem [thread:$0]  (!%p3447_p6), %s3444_s23, 16, %s3451_s14, %s3453_s15  }
  0x38   : > { %s3484_s27 = sadd.s32 4294967295, %s3296_s30   ;;  %p245_p10 = scmp.ne.s32.totalorder %s3280_s26, %s3276_s25 }
  0x39   : > { %p4033_p13 = scmp.eq.s32.totalorder %s3484_s27, 0  ;;  %p2609_p0 = scmp.ge.s32.totalorder %s3296_s30, 1 }
  0x3a   : > { %p412_p1 = scmp.lt.s32.totalorder %s3296_s30, 3  ;;  %s3299_s14 = smov [#allocation2]  }
  0x3b   : > { %p3493_p2 = por %p4033_p13, %p245_p10  ;;  %s427_s23 = sshll.u32 %s3299_s14, 4  ;;  %s3501_s23 = int_to_ptr.vmem [resolvable:$true] %s427_s23 }
  0x3c   : > { %p3497_p3 = pnand %p2609_p0, %p412_p1  ;;  %s4060_s8 = sld [smem:[#allocation25_spill]] }
  0x3d   : > { %s4058_s29 = scalar_select %p3493_p2, 1, 0 }
  0x3e   : > { %s4059_s20 = scalar_select %p3497_p3, 1, 0 }
  0x3f   : > { %p2952_p4 = pneg %p3497_p3  ;;  %s501_s13 = scalar_lea.vmem [#allocation7], %s3432_s18 }
  0x40   : > { %s508_s7 = sshll.u32 %s501_s13, 4  ;;  %s4062_s0 = sld [smem:[#allocation20_spill]]  ;;  %s3518_s7 = int_to_ptr.vmem [resolvable:$true] %s508_s7 }
  0x41   : > { %p3513_p5 = pnand %p2952_p4, %p4033_p13 }
  0x42   : > { %s3509_s22 = scalar_lea.hbm %s4060_s8, %s3435_s19 }
  0x43   : > { %p3122_p9 = pneg %p3513_p5 }
  0x46   : > { %s3120_s11 = scalar_lea.hbm %s4062_s0, 256 }
  0x47   : > { %p3121_p7 = scmp.ne.s32.totalorder %s4062_s0, %s3120_s11  ;;  %p3127_p10 = scmp.lt.u32.totalorder %s3120_s11, %s4062_s0 }
  0x49   : > { %p3123_p11 = pnand %p3122_p9, %p3121_p7 }
  0x4b   : > { %p3124_p12 = pneg %p3123_p11 }
  0x4d   : > { %p3129_p0 = pnand %p3127_p10, %p3124_p12 }
  0x4f   : > { %3132 = shalt.err (!%p3129_p0)
}
  0x50   : > { %s3133_s13 = scalar_lea.vmem %s3501_s23, 256  ;;  %p3141_p2 = scmp.lt.s32.totalorder %s3501_s23, %s3501_s23 }
  0x51   : > { %p3134_p1 = scmp.ne.s32.totalorder %s3501_s23, %s3133_s13  ;;  %p3142_p3 = scmp.lt.s32.totalorder %s3133_s13, %s3133_s13 }
  0x53   : > { %p3136_p4 = pnand %p3134_p1, %p3122_p9  ;;  %p3143_p6 = por %p3142_p3, %p3141_p2 }
  0x55   : > { %p3137_p13 = pneg %p3136_p4 }
  0x57   : > { %p3144_p8 = pnand %p3143_p6, %p3137_p13 }
  0x59   : > { %3147 = shalt.err (!%p3144_p8)
}
  0x5a   : > { %s3300_s9 = smov 128   ;;  %s3301_s11 = smov 8  }
  0x5b   : > { %2955 = dma.hbm_to_vmem [thread:$0]  (!%p3513_p5), %s4062_s0, 256, %s3501_s23, [#allocation3], %s3300_s9, %s3300_s9, %s3301_s11  }
  0x5c   : > { %s3148_s14 = scalar_lea.hbm %s3509_s22, 16  ;;  %p4063_p9 = scmp.ne.s32.totalorder %s4057_s21, 0 }
  0x5d   : > { %p3149_p7 = scmp.ne.s32.totalorder %s3509_s22, %s3148_s14  ;;  %s3153_s13 = scalar_lea.hbm %s4060_s8, 32 }
  0x5e   : > { %p3154_p8 = scmp.lt.u32.totalorder %s3509_s22, %s4060_s8  ;;  %p3155_p13 = scmp.lt.u32.totalorder %s3153_s13, %s3148_s14 }
  0x5f   : > { %p3151_p2 = pnand %p3149_p7, %p4063_p9  ;;  %p3157_p11 = scmp.lt.u32.totalorder %s3148_s14, %s3509_s22 }
  0x60   : > { %p3156_p3 = por %p3155_p13, %p3154_p8 }
  0x61   : > { %p3152_p6 = pneg %p3151_p2 }
  0x62   : > { %p3158_p12 = por %p3157_p11, %p3156_p3 }
  0x64   : > { %p3159_p10 = pnand %p3158_p12, %p3152_p6 }
  0x66   : > { %3162 = shalt.err (!%p3159_p10)
}
  0x67   : > { %s3163_s23 = scalar_lea.vmem %s3518_s7, 16  ;;  %s3302_s24 = smov [#allocation7]  }
  0x68   : > { %p3164_p5 = scmp.ne.s32.totalorder %s3518_s7, %s3163_s23  ;;  %s3168_s9 = sshll.u32 %s3302_s24, 4  ;;  %s3169_s9 = int_to_ptr.vmem [resolvable:$false] %s3168_s9 }
  0x69   : > { %s3170_s5 = scalar_lea.vmem %s3169_s9, 32  ;;  %p3171_p4 = scmp.lt.s32.totalorder %s3518_s7, %s3169_s9 }
  0x6a   : > { %p3166_p0 = pnand %p3164_p5, %p4063_p9  ;;  %p3172_p7 = scmp.lt.s32.totalorder %s3170_s5, %s3163_s23 }
  0x6c   : > { %p3167_p1 = pneg %p3166_p0  ;;  %p3173_p2 = por %p3172_p7, %p3171_p4 }
  0x6e   : > { %p3174_p8 = pnand %p3173_p2, %p3167_p1 }
  0x70   : > { %3177 = shalt.err (!%p3174_p8)
}
  0x71   : > { %p4064_p6 = scmp.ne.s32.totalorder %s4056_s16, 0  ;;  %s3567_s12 = scalar_lea.hbm %s4024_s10, %s3435_s19 }
  0x72   : > { %s526_s30 = scalar_lea.vmem [#allocation8], %s3432_s18  ;;  %s524_s25 = scalar_lea.sflag [#allocation9], %s3432_s18 }
  0x73   : > { %2962 = dma.hbm_to_vmem [thread:$0]  (!%p4064_p6), %s3509_s22, 16, %s3518_s7, %s3453_s15  }
  0x74   : > { %s533_s14 = sshll.u32 %s526_s30, 4  ;;  %s3178_s17 = scalar_lea.hbm %s3567_s12, 16  ;;  %s534_s14 = int_to_ptr.vmem [resolvable:$true] %s533_s14 }
  0x75   : > { %p3179_p13 = scmp.ne.s32.totalorder %s3567_s12, %s3178_s17  ;;  %s3183_s15 = scalar_lea.hbm %s4024_s10, 32 }
  0x76   : > { %p3184_p12 = scmp.lt.u32.totalorder %s3567_s12, %s4024_s10  ;;  %p3185_p10 = scmp.lt.u32.totalorder %s3183_s15, %s3178_s17 }
  0x77   : > { %p3181_p3 = pnand %p3179_p13, %p4063_p9  ;;  %p3187_p0 = scmp.lt.u32.totalorder %s3178_s17, %s3567_s12 }
  0x78   : > { %p3186_p5 = por %p3185_p10, %p3184_p12 }
  0x79   : > { %p3182_p11 = pneg %p3181_p3 }
  0x7a   : > { %p3188_p1 = por %p3187_p0, %p3186_p5 }
  0x7c   : > { %p3189_p4 = pnand %p3188_p1, %p3182_p11 }
  0x7e   : > { %3192 = shalt.err (!%p3189_p4)
}
  0x7f   : > { %s3193_s18 = scalar_lea.vmem %s534_s14, 16  ;;  %s3303_s23 = smov [#allocation8]  }
  0x80   : > { %p3194_p7 = scmp.ne.s32.totalorder %s534_s14, %s3193_s18  ;;  %s3198_s24 = sshll.u32 %s3303_s23, 4  ;;  %s3199_s24 = int_to_ptr.vmem [resolvable:$false] %s3198_s24 }
  0x81   : > { %s3200_s9 = scalar_lea.vmem %s3199_s24, 32  ;;  %p3201_p13 = scmp.lt.s32.totalorder %s534_s14, %s3199_s24 }
  0x82   : > { %p3196_p2 = pnand %p3194_p7, %p4063_p9  ;;  %p3202_p3 = scmp.lt.s32.totalorder %s3200_s9, %s3193_s18 }
  0x84   : > { %p3197_p8 = pneg %p3196_p2  ;;  %p3203_p6 = por %p3202_p3, %p3201_p13 }
  0x86   : > { %p3204_p10 = pnand %p3203_p6, %p3197_p8 }
  0x88   : > { %3207 = shalt.err (!%p3204_p10)
}
  0x89   : > { %p4065_p12 = scmp.ne.s32.totalorder %s4056_s16, 0  ;;  %p4066_p11 = scmp.ne.s32.totalorder %s4059_s20, 0 }
  0x8a   : > { %p4067_p5 = scmp.eq.s32.totalorder (!%p4066_p11), %s3484_s27, 0 }
  0x8b   : > { %2965 = dma.hbm_to_vmem [thread:$0]  (!%p4065_p12), %s3567_s12, 16, %s534_s14, %s524_s25  }
  0x8c   : > { %556 = sbr.rel (%p4066_p11) target bundleno = 4776 (0x12a8), region = 72 }
  0x93   : > { %3259 = dma.done.wait (%p4067_p5), [#allocation3], 256   ;;  %p4068_p9 = pmov %p4067_p5 }
  0x94   : > { %s562_s21 = sand.u32 1, %s3484_s27   ;;  %s3596_s5 = sand.u32 1, %s3280_s26  }
  0x95   : > { %3261 = vsyncadd (%p4068_p9), [#allocation3], 4294967040  ;;  %s563_s6 = scalar_lea.sflag [#allocation6], %s562_s21  ;;  %p4069_p6 = scmp.ne.s32.totalorder %s4058_s29, 0 }
  0x97   : > { %3263 = dma.done.wait (%p4069_p6), %s563_s6, 32  }
  0x98   : > { %3265 = vsyncadd (%p4069_p6), %s563_s6, 4294967264  ;;  %s579_s11 = scalar_lea.sflag [#allocation9], %s3596_s5 }
  0x99   : > { %3267 = dma.done.wait (%p4069_p6), %s579_s11, 16  }
  0x9a   : > { %3269 = vsyncadd (%p4069_p6), %s579_s11, 4294967280  ;;  %p662_p0 = scmp.lt.s32.totalorder %s3288_s28, 1  ;;  %s4070_s3 = sld [smem:[#allocation21_spill]] }
  0x9b   : > { %s4071_s11 = sld [smem:[#allocation22_spill]]  ;;  %s4072_s20 = sld [smem:[#allocation23_spill]] }
  0x9c   : > { %s3612_s30 = scalar_select %p662_p0, %s3288_s28, 1 }
  0x9d   : > { %s4073_s29 = sld [smem:[#allocation26_spill]]  ;;  %s4074_s23 = sld [smem:[#allocation28_spill]] }
  0x9e   : > { %s2675_s15 = sshll.u32 %s3612_s30, 4  ;;  %s2678_s22 = sshll.u32 %s3612_s30, 5 }
  0x9f   : > { %s4075_s8 = sld [smem:[#allocation27_spill]]  ;;  %p2625_p1 = scmp.ne.s32.totalorder %s3288_s28, 0 }
  0xa0   : > { %s3630_s9 = scalar_lea.vmem %s4070_s3, %s2675_s15  ;;  %v703_v0 = vld [vmem:[#allocation2] sm:$0xff] (!%p2625_p1)  ;;  %vm705_vm0 = vcmask (!%p2625_p1), 261120   ;;  %v704_v1 = vld [vmem:[#allocation2 + $0x8] sm:$0xff] (!%p2625_p1) }
  0xa1   : > { %s3635_s14 = scalar_lea.vmem %s4071_s11, %s2675_s15  ;;  %s683_s13 = scalar_lea.vmem %s4072_s20, %s3612_s30  ;;  %706 = vst.msk [vmem:[#allocation10] sm:$0xff] (!%p2625_p1), %vm705_vm0, %v703_v0  ;;  %707 = vst.msk [vmem:[#allocation10 + $0x8] sm:$0xff] (!%p2625_p1), %vm705_vm0, %v704_v1 }
  0xa2   : > { %702 = sbr.rel (%p2625_p1) target bundleno = 169 (0xa9), region = 92 }
  0xa3   : > { %s3644_s17 = scalar_lea.vmem %s4073_s29, %s2675_s15  ;;  %s696_s24 = scalar_lea.vmem %s4074_s23, %s3612_s30 }
  0xa5   : > { %s3654_s21 = scalar_lea.vmem %s4075_s8, %s2678_s22 }
  0xa9 PF: > { %v3657_v2 = vld [vmem:[#allocation10] sm:$0xff]  ;;  %vm712_vm1 = vcmask 261120   ;;  %v3659_v3 = vld [vmem:[#allocation10 + $0x8] sm:$0xff]  ;;  %v3304_v17 = vmov 0.0   ;;  %v3039_v18 = vld [vmem:[%s3630_s9 + $0x8] sm:$0xff]   ;;  %vm3305_vm2 = vmmov 0   ;;  %s4076_s8 = scalar_lea.vmem %s4015_s1, %s3612_s30  ;;  %s4077_s20 = scalar_lea.vmem %s4016_s2, %s3612_s30 }
  0xaa   : > { %v713_v4 = vsel %vm712_vm1, %v3657_v2, 0.0  ;;  %v716_v5 = vsel %vm712_vm1, %v3659_v3, 0.0  ;;  %v3038_v16 = vld [vmem:[%s3630_s9] sm:$0xff]   ;;  %2746 = vmatprep.subr.bf16.mxu0 %v3304_v17  ;;  %2754 = vmatprep.subr.bf16.mxu1 %v3304_v17  ;;  %s4078_s15 = scalar_lea.vmem %s4018_s4, %s3612_s30  ;;  %s3306_s18 = smov 88   ;;  %vm832_vm3 = vcmask 64512   ;;  %vm894_vm4 = vcmask 1043456  }
  0xab   : > { %714 = vadd.xlane.f32.xlu0 %v713_v4  ;;  %2747 = vmatpush3.bf16.msra.mxu0 %v3038_v16  ;;  %v2626_v27 = vld [vmem:[%s4076_s8] ss:$0 sm:$0xff]  ;;  %s3307_s9 = smov 96   ;;  %s3308_s6 = smov 120   ;;  %vm2234_vm5 = vcmask 523264  }
  0xac   : > { %2750 = vmatprep.mubr.msk.bf16.mxu0 %vm3305_vm2, %v3304_v17  ;;  %2748 = vmatprep.subr.bf16.mxu0 %v3304_v17  ;;  %v2627_v31 = vld [vmem:[%s4077_s20] ss:$0 sm:$0xff]  ;;  %s3309_s11 = smov 56   ;;  %s3310_s25 = smov 64  }
  0xad   : > { %2756 = vmatprep.mubr.msk.bf16.mxu1 %vm3305_vm2, %v3304_v17  ;;  %v2628_v36 = vld [vmem:[%s4078_s15] ss:$0 sm:$0xff]  ;;  %s3311_s7 = smov 80   ;;  %s3312_s22 = smov 112  }
  0xae   : > { %s3313_s19 = smov 48   ;;  %s3314_s23 = smov 72  }
  0xaf   : > { %717 = vadd.xlane.f32.xlu0 %v716_v5  ;;  %2749 = vmatpush3.bf16.msra.mxu0 %v3039_v18  ;;  %s3315_s0 = smov 104   ;;  %s3316_s3 = smov 40  }
  0xb0   : > { %2760 = vmatprep.subr.bf16.mxu0 %v3304_v17  ;;  %s3317_s12 = smov [#allocation10]   ;;  %p2969_p4 = scmp.eq.s32.totalorder %s3484_s27, 1 }
  0xb1   : > { %s2403_s29 = sshll.u32 %s3317_s12, 4  ;;  %s2404_s29 = int_to_ptr.vmem [resolvable:$true] %s2403_s29 }
  0xb2   : > { %s3208_s30 = scalar_lea.vmem %s2404_s29, 256  ;;  %p3215_p13 = scmp.lt.s32.totalorder %s2404_s29, %s2404_s29 }
  0xb3   : > { %p3209_p7 = scmp.ne.s32.totalorder %s2404_s29, %s3208_s30  ;;  %p3216_p3 = scmp.lt.s32.totalorder %s3208_s30, %s3208_s30 }
  0xb5   : > { %p3210_p2 = pnand %p3209_p7, %p2969_p4  ;;  %p3217_p10 = por %p3216_p3, %p3215_p13 }
  0xb7   : > { %p3211_p8 = pneg %p3210_p2 }
  0xb9   : > { %p3218_p12 = pnand %p3217_p10, %p3211_p8 }
 0x138   : > { %v715_v6 = vpop.xlane.xlu0 %714 }
 0x139   : > { %v720_v7 = vmul.f32 0.03125, %v715_v6 }
 0x13b   : > { %v722_v8 = vsub.f32 %v3657_v2, %v720_v7 }
 0x13c   : > { %v718_v9 = vpop.xlane.xlu0 %717 }
 0x13d   : > { %v721_v10 = vmul.f32 0.03125, %v718_v9  ;;  %v724_v11 = vmul.f32 %v722_v8, %v722_v8 }
 0x13f   : > { %v723_v12 = vsub.f32 %v3659_v3, %v721_v10  ;;  %v726_v13 = vsel %vm712_vm1, %v724_v11, 0.0 }
 0x140   : > { %727 = vadd.xlane.f32.xlu1 %v726_v13  ;;  %v824_v13 = vld [vmem:[%s3635_s14] sm:$0xf] }
 0x141   : > { %v725_v14 = vmul.f32 %v723_v12, %v723_v12 }
 0x143   : > { %v729_v15 = vsel %vm712_vm1, %v725_v14, 0.0  ;;  %v3744_v14 = vsel %vm894_vm4, %v824_v13, 0 }
 0x144   : > { %730 = vadd.xlane.f32.xlu1 %v729_v15  ;;  %v825_v15 = vld [vmem:[%s3635_s14 + $0x4] sm:$0xf] }
 0x145   : > { %v3750_v16 = vsel %vm894_vm4, %v825_v15, 0 }
 0x1cd   : > { %v728_v19 = vpop.xlane.xlu1 %727 }
 0x1ce   : > { %v732_v20 = vmul.f32 0.03125, %v728_v19 }
 0x1d0   : > { %v734_v21 = vadd.f32 1e-05, %v732_v20 }
 0x1d1   : > { %v731_v22 = vpop.xlane.xlu1 %730 }
 0x1d2   : > { %3046 = vrsqrt.f32 %v734_v21  ;;  %v733_v23 = vmul.f32 0.03125, %v731_v22 }
 0x1d4   : > { %v735_v24 = vadd.f32 1e-05, %v733_v23 }
 0x1d6   : > { %3048 = vrsqrt.f32 %v735_v24 }
 0x1dc   : > { %v3047_v25 = vpop.eup %3046 }
 0x1dd   : > { %v738_v26 = vmul.f32 %v3047_v25, %v722_v8 }
 0x1df   : > { %v746_v30 = vmul.f32 %v2626_v27, %v738_v26 }
 0x1e0   : > { %v3049_v28 = vpop.eup %3048 }
 0x1e1   : > { %v739_v29 = vmul.f32 %v3049_v28, %v723_v12  ;;  %v754_v33 = vadd.f32 %v2627_v31, %v746_v30 }
 0x1e3   : > { %v747_v32 = vmul.f32 %v2626_v27, %v739_v29 }
 0x1e5   : > { %v755_v34 = vadd.f32 %v2627_v31, %v747_v32 }
 0x1e7   : > { %v756_v35 = vpack.c.bf16 %v755_v34, %v754_v33 }
 0x1e9   : > { %2751 = vmatmul.mubr.msk.bf16.vlgmr.msra.gmra.mrb[0].mxu0 %vm712_vm1, %v756_v35 }
 0x1ea   : > { %2762 = vmatprep.mubr.msk.bf16.mxu0 %vm3305_vm2, %v3304_v17 }
 0x2bc   : > { %v817_v37 = vpop.f32.mrb[0].mxu0 }
 0x2bd   : > { %v818_v38 = vadd.f32 %v2628_v36, %v817_v37  ;;  %v2752_v39 = vpop.f32.mrb[1].mxu0 }
 0x2be   : > { %v820_v40 = vpop.f32.mrb[2].mxu0 }
 0x2bf   : > { %v3697_v41 = vpack.c.bf16 %v818_v38, %v818_v38  ;;  %v3699_v42 = vadd.f32 %v2628_v36, %v820_v40  ;;  %v2753_v43 = vpop.f32.mrb[3].mxu0 }
 0x2c1   : > { %943 = vrot.lane.b32.xlu1 %v3697_v41, %s3306_s18  ;;  %830 = vrot.lane.b32.xlu0 %v3697_v41, %s3307_s9 }
 0x2c5   : > { %941 = vrot.lane.b32.xlu1 %v3697_v41, %s3308_s6 }
 0x333   : > { %v831_v44 = vpop.permute.xlu0 %830  ;;  %v944_v46 = vpop.permute.xlu1 %943 }
 0x334   : > { %v837_v45 = vsel %vm832_vm3, %v831_v44, 0  ;;  %v949_v47 = vsel %vm832_vm3, %v944_v46, 0 }
 0x335   : > { %2755 = vmatpush3.bf16.xpose.msra.mxu1 %v837_v45 }
 0x336   : > { %2766 = vmatprep.subr.bf16.mxu1 %v3304_v17 }
 0x337   : > { %v942_v48 = vpop.permute.xlu1 %941 }
 0x33c   : > { %2757 = vmatmul.mubr.msk.bf16.vlgmr.msra.gmra.mrb[0].mxu1 %vm832_vm3, %v3697_v41 }
 0x33d   : > { %2767 = vmatpush3.bf16.xpose.msra.mxu1 %v949_v47  ;;  %2768 = vmatprep.mubr.msk.bf16.mxu1 %vm3305_vm2, %v3304_v17 }
 0x33e   : > { %2778 = vmatprep.subr.bf16.mxu1 %v3304_v17 }
 0x344   : > { %2769 = vmatmul.mubr.msk.bf16.vlgmr.msra.gmra.mrb[4].mxu1 %vm832_vm3, %v942_v48 }
 0x345   : > { %2780 = vmatprep.mubr.msk.bf16.mxu1 %vm3305_vm2, %v3304_v17  ;;  %2779 = vmatpush3.bf16.msra.mxu1 %v3750_v16 }
 0x346   : > { %2790 = vmatprep.subr.bf16.mxu1 %v3304_v17 }
 0x40f   : > { %v873_v49 = vpop.f32.mrb[0].mxu1 }
 0x410   : > { %v2758_v50 = vpop.f32.mrb[1].mxu1  ;;  %v879_v51 = vsel %vm832_vm3, %v873_v49, -inf }
 0x411   : > { %880 = vmax.xlane.f32.xlu1 %v879_v51  ;;  %v876_v52 = vpop.f32.mrb[2].mxu1 }
 0x412   : > { %v2759_v53 = vpop.f32.mrb[3].mxu1 }
 0x417   : > { %v985_v54 = vpop.f32.mrb[4].mxu1 }
 0x418   : > { %v2770_v55 = vpop.f32.mrb[5].mxu1  ;;  %v991_v56 = vsel %vm832_vm3, %v985_v54, -inf }
 0x419   : > { %992 = vmax.xlane.f32.xlu0 %v991_v56  ;;  %v988_v57 = vpop.f32.mrb[6].mxu1 }
 0x41a   : > { %v2771_v58 = vpop.f32.mrb[7].mxu1 }
 0x422   : > { %1001 = vrot.lane.b32.xlu1 %v3697_v41, %s3309_s11 }
 0x42f   : > { %889 = vrot.lane.b32.xlu0 %v3697_v41, %s3310_s25 }
 0x433   : > { %1146 = vrot.lane.b32.xlu0 %v3697_v41, %s3311_s7 }
 0x437   : > { %1144 = vrot.lane.b32.xlu0 %v3697_v41, %s3312_s22 }
 0x49e   : > { %v881_v59 = vpop.xlane.xlu1 %880 }
 0x49f   : > { %v882_v60 = vsub.f32 %v873_v49, %v881_v59 }
 0x4a1   : > { %v883_v61 = vmul.f32 1.442695, %v882_v60 }
 0x4a2   : > { %v1002_v6 = vpop.permute.xlu1 %1001 }
 0x4a3   : > { %3050 = vpow2.f32 %v883_v61  ;;  %v1007_v9 = vsel %vm894_vm4, %v1002_v6, 0 }
 0x4a6   : > { %v993_v62 = vpop.xlane.xlu0 %992 }
 0x4a7   : > { %v994_v63 = vsub.f32 %v985_v54, %v993_v62 }
 0x4a9   : > { %v995_v0 = vmul.f32 1.442695, %v994_v63 }
 0x4aa   : > { %v890_v1 = vpop.permute.xlu0 %889 }
 0x4ab   : > { %3052 = vpow2.f32 %v995_v0  ;;  %v896_v4 = vsel %vm894_vm4, %v890_v1, 0  ;;  %v3785_v0 = vpack.c.bf16 %v3699_v42, %v3699_v42  ;;  %v826_v1 = vld [vmem:[%s3635_s14 + $0x8] sm:$0xf] }
 0x4ac   : > { %2761 = vmatpush3.bf16.msra.mxu0 %v896_v4  ;;  %v3793_v4 = vsel %vm894_vm4, %v826_v1, 0 }
 0x4ad   : > { %v3051_v5 = vpop.eup %3050  ;;  %2772 = vmatprep.subr.bf16.mxu0 %v3304_v17 }
 0x4ae   : > { %v885_v7 = vsel %vm832_vm3, %v3051_v5, 0.0  ;;  %v888_v8 = vpack.c.bf16 %v3051_v5, %v3051_v5  ;;  %v1147_v18 = vpop.permute.xlu0 %1146 }
 0x4af   : > { %886 = vadd.xlane.f32.xlu0 %v885_v7  ;;  %v1152_v38 = vsel %vm832_vm3, %v1147_v18, 0 }
 0x4b0   : > { %2763 = vmatmul.mubr.msk.bf16.vlgmr.msra.gmra.mrb[4].mxu0 %vm832_vm3, %v888_v8 }
 0x4b1   : > { %2773 = vmatpush3.bf16.msra.mxu0 %v1007_v9  ;;  %2774 = vmatprep.mubr.msk.bf16.mxu0 %vm3305_vm2, %v3304_v17 }
 0x4b2   : > { %2784 = vmatprep.subr.bf16.mxu0 %v3304_v17  ;;  %v1145_v19 = vpop.permute.xlu0 %1144 }
 0x4b5   : > { %v3053_v10 = vpop.eup %3052 }
 0x4b6   : > { %v997_v11 = vsel %vm832_vm3, %v3053_v10, 0.0  ;;  %v1000_v12 = vpack.c.bf16 %v3053_v10, %v3053_v10 }
 0x4b7   : > { %998 = vadd.xlane.f32.xlu1 %v997_v11 }
 0x4b8   : > { %2775 = vmatmul.mubr.msk.bf16.vlgmr.msra.gmra.mrb[8].mxu0 %vm832_vm3, %v1000_v12 }
 0x4b9   : > { %2786 = vmatprep.mubr.msk.bf16.mxu0 %vm3305_vm2, %v3304_v17  ;;  %2785 = vmatpush3.bf16.msra.mxu0 %v3744_v14 }
 0x4ba   : > { %2796 = vmatprep.subr.bf16.mxu0 %v3304_v17 }
 0x4c5   : > { %1204 = vrot.lane.b32.xlu0 %v3697_v41, %s3313_s19 }
 0x53c   : > { %v887_v20 = vpop.xlane.xlu0 %886 }
 0x53d   : > { %3054 = vrcp.f32 %v887_v20 }
 0x540   : > { %v1205_v26 = vpop.permute.xlu0 %1204 }
 0x541   : > { %v1210_v30 = vsel %vm894_vm4, %v1205_v26, 0 }
 0x544   : > { %v999_v21 = vpop.xlane.xlu1 %998 }
 0x545   : > { %3056 = vrcp.f32 %v999_v21 }
 0x547   : > { %v3055_v22 = vpop.eup %3054 }
 0x54f   : > { %v3057_v31 = vpop.eup %3056 }
 0x583   : > { %v932_v23 = vpop.f32.mrb[4].mxu0 }
 0x584   : > { %v939_v24 = vmul.f32 %v3055_v22, %v932_v23  ;;  %v2764_v25 = vpop.f32.mrb[5].mxu0 }
 0x585   : > { %v935_v27 = vpop.f32.mrb[6].mxu0 }
 0x586   : > { %v940_v28 = vpack.c.bf16 %v939_v24, %v939_v24  ;;  %v2765_v29 = vpop.f32.mrb[7].mxu0 }
 0x588   : > { %2787 = vmatmul.mubr.msk.bf16.vlgmr.msra.gmra.mrb[12].mxu0 %vm832_vm3, %v940_v28 }
 0x589   : > { %2797 = vmatpush3.bf16.msra.mxu0 %v1210_v30  ;;  %2798 = vmatprep.mubr.msk.bf16.mxu0 %vm3305_vm2, %v3304_v17 }
 0x58a   : > { %2808 = vmatprep.subr.bf16.mxu0 %v3304_v17 }
 0x58b   : > { %v1043_v32 = vpop.f32.mrb[8].mxu0 }
 0x58c   : > { %v1050_v33 = vmul.f32 %v3057_v31, %v1043_v32  ;;  %v2776_v34 = vpop.f32.mrb[9].mxu0 }
 0x58d   : > { %v1046_v35 = vpop.f32.mrb[10].mxu0 }
 0x58e   : > { %v1051_v36 = vpack.c.bf16 %v1050_v33, %v1050_v33  ;;  %v2777_v37 = vpop.f32.mrb[11].mxu0 }
 0x58f   : > { %v827_v37 = vld [vmem:[%s3635_s14 + $0xc] sm:$0xf] }
 0x590   : > { %2781 = vmatmul.mubr.msk.bf16.vlgmr.msra.gmra.mrb[8].mxu1 %vm832_vm3, %v1051_v36 }
 0x591   : > { %2791 = vmatpush3.bf16.xpose.msra.mxu1 %v1152_v38  ;;  %2792 = vmatprep.mubr.msk.bf16.mxu1 %vm3305_vm2, %v3304_v17  ;;  %v3831_v38 = vsel %vm894_vm4, %v827_v37, 0 }
 0x592   : > { %2802 = vmatprep.subr.bf16.mxu1 %v3304_v17 }
 0x598   : > { %2793 = vmatmul.mubr.msk.bf16.vlgmr.msra.gmra.mrb[12].mxu1 %vm832_vm3, %v1145_v19 }
 0x599   : > { %2804 = vmatprep.mubr.msk.bf16.mxu1 %vm3305_vm2, %v3304_v17  ;;  %2803 = vmatpush3.bf16.msra.mxu1 %v3793_v4 }
 0x59a   : > { %2814 = vmatprep.subr.bf16.mxu1 %v3304_v17 }
 0x65b   : > { %v1138_v39 = vpop.f32.mrb[12].mxu0 }
 0x65c   : > { %v2788_v40 = vpop.f32.mrb[13].mxu0 }
 0x65d   : > { %v1141_v43 = vpop.f32.mrb[14].mxu0 }
 0x65e   : > { %v2789_v44 = vpop.f32.mrb[15].mxu0 }
 0x663   : > { %v1092_v45 = vpop.f32.mrb[8].mxu1 }
 0x664   : > { %v3767_v46 = vadd.f32 %v1138_v39, %v1092_v45  ;;  %v2782_v47 = vpop.f32.mrb[9].mxu1 }
 0x665   : > { %v1095_v48 = vpop.f32.mrb[10].mxu1 }
 0x666   : > { %v2783_v49 = vpop.f32.mrb[11].mxu1 }
 0x66b   : > { %v1188_v50 = vpop.f32.mrb[12].mxu1 }
 0x66c   : > { %v2794_v51 = vpop.f32.mrb[13].mxu1  ;;  %v1194_v52 = vsel %vm832_vm3, %v1188_v50, -inf }
 0x66d   : > { %1195 = vmax.xlane.f32.xlu1 %v1194_v52  ;;  %v1191_v53 = vpop.f32.mrb[14].mxu1 }
 0x66e   : > { %v2795_v54 = vpop.f32.mrb[15].mxu1 }
 0x67e   : > { %1304 = vrot.lane.b32.xlu1 %v3697_v41, %s3314_s23 }
 0x682   : > { %1302 = vrot.lane.b32.xlu1 %v3697_v41, %s3315_s0 }
 0x6fa   : > { %v1196_v55 = vpop.xlane.xlu1 %1195 }
 0x6fb   : > { %v1197_v56 = vsub.f32 %v1188_v50, %v1196_v55 }
 0x6fd   : > { %v1198_v57 = vmul.f32 1.442695, %v1197_v56 }
 0x6fe   : > { %v1305_v59 = vpop.permute.xlu1 %1304 }
 0x6ff   : > { %3058 = vpow2.f32 %v1198_v57  ;;  %v1310_v62 = vsel %vm832_vm3, %v1305_v59, 0 }
 0x702   : > { %v1303_v63 = vpop.permute.xlu1 %1302 }
 0x709   : > { %v3059_v58 = vpop.eup %3058 }
 0x70a   : > { %v1200_v60 = vsel %vm832_vm3, %v3059_v58, 0.0  ;;  %v1203_v61 = vpack.c.bf16 %v3059_v58, %v3059_v58 }
 0x70b   : > { %1201 = vadd.xlane.f32.xlu1 %v1200_v60 }
 0x70c   : > { %2799 = vmatmul.mubr.msk.bf16.vlgmr.msra.gmra.mrb[16].mxu0 %vm832_vm3, %v1203_v61 }
 0x70d   : > { %2809 = vmatpush3.bf16.xpose.msra.mxu0 %v1310_v62  ;;  %2810 = vmatprep.mubr.msk.bf16.mxu0 %vm3305_vm2, %v3304_v17 }
 0x70e   : > { %2820 = vmatprep.subr.bf16.mxu0 %v3304_v17 }
 0x714   : > { %2811 = vmatmul.mubr.msk.bf16.vlgmr.msra.gmra.mrb[20].mxu0 %vm832_vm3, %v1303_v63 }
 0x715   : > { %2822 = vmatprep.mubr.msk.bf16.mxu0 %vm3305_vm2, %v3304_v17  ;;  %2821 = vmatpush3.bf16.msra.mxu0 %v3831_v38 }
 0x716   : > { %2832 = vmatprep.subr.bf16.mxu0 %v3304_v17 }
 0x71c   : > { %1462 = vrot.lane.b32.xlu1 %v3785_v0, %s3307_s9 }
 0x720   : > { %1573 = vrot.lane.b32.xlu1 %v3785_v0, %s3306_s18 }
 0x798   : > { %v1202_v5 = vpop.xlane.xlu1 %1201 }
 0x799   : > { %3060 = vrcp.f32 %v1202_v5 }
 0x79c   : > { %v1463_v26 = vpop.permute.xlu1 %1462 }
 0x7a0   : > { %v1574_v29 = vpop.permute.xlu1 %1573 }
 0x7a1   : > { %v1579_v30 = vsel %vm832_vm3, %v1574_v29, 0 }
 0x7a3   : > { %v3061_v6 = vpop.eup %3060 }
 0x7df   : > { %v1246_v7 = vpop.f32.mrb[16].mxu0 }
 0x7e0   : > { %v1253_v42 = vmul.f32 %v3061_v6, %v1246_v7  ;;  %v2800_v8 = vpop.f32.mrb[17].mxu0 }
 0x7e1   : > { %v1249_v9 = vpop.f32.mrb[18].mxu0 }
 0x7e2   : > { %v1254_v10 = vpack.c.bf16 %v1253_v42, %v1253_v42  ;;  %v2801_v11 = vpop.f32.mrb[19].mxu0 }
 0x7e4   : > { %2805 = vmatmul.mubr.msk.bf16.vlgmr.msra.gmra.mrb[16].mxu1 %vm832_vm3, %v1254_v10 }
 0x7e5   : > { %2816 = vmatprep.mubr.msk.bf16.mxu1 %vm3305_vm2, %v3304_v17 }
 0x7e7   : > { %v1346_v12 = vpop.f32.mrb[20].mxu0 }
 0x7e8   : > { %v2812_v13 = vpop.f32.mrb[21].mxu0  ;;  %v1352_v15 = vsel %vm832_vm3, %v1346_v12, -inf }
 0x7e9   : > { %1353 = vmax.xlane.f32.xlu0 %v1352_v15  ;;  %v1349_v18 = vpop.f32.mrb[22].mxu0 }
 0x7ea   : > { %v2813_v19 = vpop.f32.mrb[23].mxu0 }
 0x7ff   : > { %1362 = vrot.lane.b32.xlu0 %v3697_v41, %s3316_s3  ;;  %v1468_v41 = vsel %vm832_vm3, %v1463_v26, 0 }
 0x803   : > { %1571 = vrot.lane.b32.xlu0 %v3785_v0, %s3308_s6 }
 0x876   : > { %v1354_v20 = vpop.xlane.xlu0 %1353 }
 0x877   : > { %v1355_v21 = vsub.f32 %v1346_v12, %v1354_v20 }
 0x879   : > { %v1356_v22 = vmul.f32 1.442695, %v1355_v21 }
 0x87a   : > { %v1363_v23 = vpop.permute.xlu0 %1362 }
 0x87b   : > { %3062 = vpow2.f32 %v1356_v22  ;;  %v1368_v24 = vsel %vm894_vm4, %v1363_v23, 0 }
 0x87c   : > { %2815 = vmatpush3.bf16.msra.mxu1 %v1368_v24 }
 0x87d   : > { %2826 = vmatprep.subr.bf16.mxu1 %v3304_v17 }
 0x87e   : > { %v1572_v31 = vpop.permute.xlu0 %1571 }
 0x885   : > { %v3063_v25 = vpop.eup %3062 }
 0x886   : > { %v1358_v27 = vsel %vm832_vm3, %v3063_v25, 0.0  ;;  %v1361_v28 = vpack.c.bf16 %v3063_v25, %v3063_v25 }
 0x887   : > { %1359 = vadd.xlane.f32.xlu1 %v1358_v27 }
 0x888   : > { %2817 = vmatmul.mubr.msk.bf16.vlgmr.msra.gmra.mrb[20].mxu1 %vm832_vm3, %v1361_v28 }
 0x889   : > { %2827 = vmatpush3.bf16.xpose.msra.mxu1 %v1468_v41  ;;  %2828 = vmatprep.mubr.msk.bf16.mxu1 %vm3305_vm2, %v3304_v17 }
 0x88a   : > { %2838 = vmatprep.subr.bf16.mxu1 %v3304_v17 }
 0x890   : > { %2829 = vmatmul.mubr.msk.bf16.vlgmr.msra.gmra.mrb[24].mxu1 %vm832_vm3, %v3785_v0 }
 0x891   : > { %2839 = vmatpush3.bf16.xpose.msra.mxu1 %v1579_v30  ;;  %2840 = vmatprep.mubr.msk.bf16.mxu1 %vm3305_vm2, %v3304_v17 }
 0x892   : > { %2850 = vmatprep.subr.bf16.mxu1 %v3304_v17 }
 0x898   : > { %1631 = vrot.lane.b32.xlu1 %v3785_v0, %s3309_s11  ;;  %2841 = vmatmul.mubr.msk.bf16.vlgmr.msra.gmra.mrb[28].mxu1 %vm832_vm3, %v1572_v31 }
 0x899   : > { %2851 = vmatpush3.bf16.msra.mxu1 %v3750_v16  ;;  %2852 = vmatprep.mubr.msk.bf16.mxu1 %vm3305_vm2, %v3304_v17 }
 0x89a   : > { %2862 = vmatprep.subr.bf16.mxu1 %v3304_v17 }
 0x8b7   : > { %v1295_v32 = vpop.f32.mrb[16].mxu1 }
 0x8b8   : > { %v3827_v33 = vadd.f32 %v1295_v32, %v3767_v46  ;;  %v2806_v34 = vpop.f32.mrb[17].mxu1 }
 0x8b9   : > { %v1298_v35 = vpop.f32.mrb[18].mxu1 }
 0x8ba   : > { %v2807_v36 = vpop.f32.mrb[19].mxu1 }
 0x914   : > { %v1360_v16 = vpop.xlane.xlu1 %1359 }
 0x915   : > { %3064 = vrcp.f32 %v1360_v16 }
 0x918   : > { %v1632_v7 = vpop.permute.xlu1 %1631 }
 0x919   : > { %v1637_v9 = vsel %vm894_vm4, %v1632_v7, 0 }
 0x91f   : > { %v3065_v39 = vpop.eup %3064 }
 0x95b   : > { %v1404_v40 = vpop.f32.mrb[20].mxu1 }
 0x95c   : > { %v1411_v43 = vmul.f32 %v3065_v39, %v1404_v40  ;;  %v2818_v44 = vpop.f32.mrb[21].mxu1 }
 0x95d   : > { %v1407_v45 = vpop.f32.mrb[22].mxu1 }
 0x95e   : > { %v1412_v46 = vpack.c.bf16 %v1411_v43, %v1411_v43  ;;  %v2819_v47 = vpop.f32.mrb[23].mxu1 }
 0x960   : > { %2823 = vmatmul.mubr.msk.bf16.vlgmr.msra.gmra.mrb[24].mxu0 %vm832_vm3, %v1412_v46 }
 0x961   : > { %2834 = vmatprep.mubr.msk.bf16.mxu0 %vm3305_vm2, %v3304_v17 }
 0x963   : > { %v1504_v48 = vpop.f32.mrb[24].mxu1 }
 0x964   : > { %v2830_v49 = vpop.f32.mrb[25].mxu1  ;;  %v1510_v50 = vsel %vm832_vm3, %v1504_v48, -inf }
 0x965   : > { %1511 = vmax.xlane.f32.xlu0 %v1510_v50  ;;  %v1507_v51 = vpop.f32.mrb[26].mxu1 }
 0x966   : > { %v2831_v52 = vpop.f32.mrb[27].mxu1 }
 0x96b   : > { %v1615_v53 = vpop.f32.mrb[28].mxu1 }
 0x96c   : > { %v2842_v54 = vpop.f32.mrb[29].mxu1  ;;  %v1621_v55 = vsel %vm832_vm3, %v1615_v53, -inf }
 0x96d   : > { %1622 = vmax.xlane.f32.xlu0 %v1621_v55  ;;  %v1618_v56 = vpop.f32.mrb[30].mxu1 }
 0x96e   : > { %v2843_v57 = vpop.f32.mrb[31].mxu1 }
 0x983   : > { %1520 = vrot.lane.b32.xlu0 %v3785_v0, %s3310_s25 }
 0x987   : > { %1770 = vrot.lane.b32.xlu0 %v3785_v0, %s3311_s7 }
 0x98b   : > { %1768 = vrot.lane.b32.xlu0 %v3785_v0, %s3312_s22 }
 0x9f2   : > { %v1512_v58 = vpop.xlane.xlu0 %1511 }
 0x9f3   : > { %v1513_v59 = vsub.f32 %v1504_v48, %v1512_v58 }
 0x9f5   : > { %v1514_v60 = vmul.f32 1.442695, %v1513_v59 }
 0x9f7   : > { %3066 = vpow2.f32 %v1514_v60 }
 0x9fa   : > { %v1623_v61 = vpop.xlane.xlu0 %1622 }
 0x9fb   : > { %v1624_v62 = vsub.f32 %v1615_v53, %v1623_v61 }
 0x9fd   : > { %v1625_v63 = vmul.f32 1.442695, %v1624_v62 }
 0x9fe   : > { %v1521_v1 = vpop.permute.xlu0 %1520 }
 0x9ff   : > { %3068 = vpow2.f32 %v1625_v63  ;;  %v1526_v5 = vsel %vm894_vm4, %v1521_v1, 0 }
 0xa00   : > { %2833 = vmatpush3.bf16.msra.mxu0 %v1526_v5 }
 0xa01   : > { %v3067_v6 = vpop.eup %3066  ;;  %2844 = vmatprep.subr.bf16.mxu0 %v3304_v17 }
 0xa02   : > { %v1516_v42 = vsel %vm832_vm3, %v3067_v6, 0.0  ;;  %v1519_v8 = vpack.c.bf16 %v3067_v6, %v3067_v6  ;;  %v1771_v21 = vpop.permute.xlu0 %1770 }
 0xa03   : > { %1517 = vadd.xlane.f32.xlu0 %v1516_v42  ;;  %v1776_v37 = vsel %vm832_vm3, %v1771_v21, 0 }
 0xa04   : > { %2835 = vmatmul.mubr.msk.bf16.vlgmr.msra.gmra.mrb[28].mxu0 %vm832_vm3, %v1519_v8 }
 0xa05   : > { %2845 = vmatpush3.bf16.msra.mxu0 %v1637_v9  ;;  %2846 = vmatprep.mubr.msk.bf16.mxu0 %vm3305_vm2, %v3304_v17 }
 0xa06   : > { %2856 = vmatprep.subr.bf16.mxu0 %v3304_v17  ;;  %v1769_v22 = vpop.permute.xlu0 %1768 }
 0xa09   : > { %v3069_v10 = vpop.eup %3068 }
 0xa0a   : > { %v1627_v11 = vsel %vm832_vm3, %v3069_v10, 0.0  ;;  %v1630_v12 = vpack.c.bf16 %v3069_v10, %v3069_v10 }
 0xa0b   : > { %1628 = vadd.xlane.f32.xlu1 %v1627_v11 }
 0xa0c   : > { %2847 = vmatmul.mubr.msk.bf16.vlgmr.msra.gmra.mrb[32].mxu0 %vm832_vm3, %v1630_v12 }
 0xa0d   : > { %2857 = vmatpush3.bf16.msra.mxu0 %v3744_v14  ;;  %2858 = vmatprep.mubr.msk.bf16.mxu0 %vm3305_vm2, %v3304_v17 }
 0xa0e   : > { %2868 = vmatprep.subr.bf16.mxu0 %v3304_v17 }
 0xa19   : > { %1925 = vrot.lane.b32.xlu0 %v3785_v0, %s3314_s23 }
 0xa33   : > { %v1453_v13 = vpop.f32.mrb[24].mxu0 }
 0xa34   : > { %v3863_v15 = vadd.f32 %v1453_v13, %v3827_v33  ;;  %v2824_v18 = vpop.f32.mrb[25].mxu0 }
 0xa35   : > { %v1456_v19 = vpop.f32.mrb[26].mxu0 }
 0xa36   : > { %v2825_v20 = vpop.f32.mrb[27].mxu0 }
 0xa90   : > { %v1518_v23 = vpop.xlane.xlu0 %1517 }
 0xa91   : > { %3070 = vrcp.f32 %v1518_v23 }
 0xa94   : > { %v1926_v59 = vpop.permute.xlu0 %1925 }
 0xa95   : > { %v1931_v62 = vsel %vm832_vm3, %v1926_v59, 0 }
 0xa98   : > { %v1629_v14 = vpop.xlane.xlu1 %1628 }
 0xa99   : > { %3072 = vrcp.f32 %v1629_v14  ;;  %v2078_v14 = vadd.f32 %v3863_v15, %v3657_v2 }
 0xa9b   : > { %v3071_v24 = vpop.eup %3070 }
 0xaa3   : > { %v3073_v30 = vpop.eup %3072 }
 0xad7   : > { %v1562_v25 = vpop.f32.mrb[28].mxu0 }
 0xad8   : > { %v1569_v26 = vmul.f32 %v3071_v24, %v1562_v25  ;;  %v2836_v27 = vpop.f32.mrb[29].mxu0  ;;  %v2656_v24 = vld [vmem:[%s683_s13] ss:$0 sm:$0xff]  ;;  %s4081_s13 = scalar_lea.vmem [#allocation7], %s3596_s5 }
 0xad9   : > { %v1565_v28 = vpop.f32.mrb[30].mxu0 }
 0xada   : > { %v1570_v41 = vpack.c.bf16 %v1569_v26, %v1569_v26  ;;  %v2837_v29 = vpop.f32.mrb[31].mxu0 }
 0xadc   : > { %2859 = vmatmul.mubr.msk.bf16.vlgmr.msra.gmra.mrb[36].mxu0 %vm832_vm3, %v1570_v41 }
 0xadd   : > { %2870 = vmatprep.mubr.msk.bf16.mxu0 %vm3305_vm2, %v3304_v17 }
 0xadf   : > { %v1673_v31 = vpop.f32.mrb[32].mxu0 }
 0xae0   : > { %v1680_v32 = vmul.f32 %v3073_v30, %v1673_v31  ;;  %v2848_v33 = vpop.f32.mrb[33].mxu0 }
 0xae1   : > { %v1676_v34 = vpop.f32.mrb[34].mxu0 }
 0xae2   : > { %v1681_v35 = vpack.c.bf16 %v1680_v32, %v1680_v32  ;;  %v2849_v36 = vpop.f32.mrb[35].mxu0 }
 0xae4   : > { %2853 = vmatmul.mubr.msk.bf16.vlgmr.msra.gmra.mrb[32].mxu1 %vm832_vm3, %v1681_v35 }
 0xae5   : > { %2863 = vmatpush3.bf16.xpose.msra.mxu1 %v1776_v37  ;;  %2864 = vmatprep.mubr.msk.bf16.mxu1 %vm3305_vm2, %v3304_v17 }
 0xae6   : > { %2874 = vmatprep.subr.bf16.mxu1 %v3304_v17 }
 0xaec   : > { %2865 = vmatmul.mubr.msk.bf16.vlgmr.msra.gmra.mrb[36].mxu1 %vm832_vm3, %v1769_v22 }
 0xaed   : > { %2875 = vmatpush3.bf16.msra.mxu1 %v3793_v4  ;;  %2876 = vmatprep.mubr.msk.bf16.mxu1 %vm3305_vm2, %v3304_v17 }
 0xaee   : > { %2886 = vmatprep.subr.bf16.mxu1 %v3304_v17 }
 0xbaf   : > { %v1762_v16 = vpop.f32.mrb[36].mxu0 }
 0xbb0   : > { %v2860_v39 = vpop.f32.mrb[37].mxu0 }
 0xbb1   : > { %v1765_v40 = vpop.f32.mrb[38].mxu0 }
 0xbb2   : > { %v2861_v43 = vpop.f32.mrb[39].mxu0 }
 0xbb7   : > { %v1719_v44 = vpop.f32.mrb[32].mxu1 }
 0xbb8   : > { %v3878_v45 = vadd.f32 %v1762_v16, %v1719_v44  ;;  %v2854_v46 = vpop.f32.mrb[33].mxu1 }
 0xbb9   : > { %v1722_v47 = vpop.f32.mrb[34].mxu1 }
 0xbba   : > { %v2855_v48 = vpop.f32.mrb[35].mxu1 }
 0xbbf   : > { %v1812_v49 = vpop.f32.mrb[36].mxu1 }
 0xbc0   : > { %v2866_v50 = vpop.f32.mrb[37].mxu1  ;;  %v1818_v51 = vsel %vm832_vm3, %v1812_v49, -inf }
 0xbc1   : > { %1819 = vmax.xlane.f32.xlu1 %v1818_v51  ;;  %v1815_v4 = vpop.f32.mrb[38].mxu1 }
 0xbc2   : > { %v2867_v52 = vpop.f32.mrb[39].mxu1 }
 0xbd2   : > { %1828 = vrot.lane.b32.xlu1 %v3785_v0, %s3313_s19 }
 0xbd6   : > { %1923 = vrot.lane.b32.xlu1 %v3785_v0, %s3315_s0 }
 0xc4e   : > { %v1820_v53 = vpop.xlane.xlu1 %1819 }
 0xc4f   : > { %v1821_v54 = vsub.f32 %v1812_v49, %v1820_v53  ;;  %v3040_v53 = vld [vmem:[%s3644_s17] sm:$0xff]  }
 0xc51   : > { %v1822_v55 = vmul.f32 1.442695, %v1821_v54  ;;  %v3041_v54 = vld [vmem:[%s3644_s17 + $0x8] sm:$0xff]   ;;  %s4080_s17 = scalar_lea.vmem [#allocation5], %s3596_s5 }
 0xc52   : > { %v1829_v56 = vpop.permute.xlu1 %1828 }
 0xc53   : > { %3074 = vpow2.f32 %v1822_v55  ;;  %v1834_v57 = vsel %vm894_vm4, %v1829_v56, 0 }
 0xc54   : > { %2869 = vmatpush3.bf16.msra.mxu0 %v1834_v57 }
 0xc55   : > { %2880 = vmatprep.subr.bf16.mxu0 %v3304_v17 }
 0xc56   : > { %v1924_v63 = vpop.permute.xlu1 %1923 }
 0xc5d   : > { %v3075_v58 = vpop.eup %3074 }
 0xc5e   : > { %v1824_v60 = vsel %vm832_vm3, %v3075_v58, 0.0  ;;  %v1827_v61 = vpack.c.bf16 %v3075_v58, %v3075_v58 }
 0xc5f   : > { %1825 = vadd.xlane.f32.xlu1 %v1824_v60 }
 0xc60   : > { %2871 = vmatmul.mubr.msk.bf16.vlgmr.msra.gmra.mrb[40].mxu0 %vm832_vm3, %v1827_v61 }
 0xc61   : > { %2881 = vmatpush3.bf16.xpose.msra.mxu0 %v1931_v62  ;;  %2882 = vmatprep.mubr.msk.bf16.mxu0 %vm3305_vm2, %v3304_v17 }
 0xc62   : > { %2892 = vmatprep.subr.bf16.mxu0 %v3304_v17 }
 0xc68   : > { %2883 = vmatmul.mubr.msk.bf16.vlgmr.msra.gmra.mrb[44].mxu0 %vm832_vm3, %v1924_v63  ;;  %v2657_v63 = vld [vmem:[%s4080_s17] ss:$0 sm:$0xff] }
 0xc69   : > { %2893 = vmatpush3.bf16.msra.mxu0 %v3831_v38  ;;  %2894 = vmatprep.mubr.msk.bf16.mxu0 %vm3305_vm2, %v3304_v17 }
 0xc6a   : > { %2906 = vmatprep.subr.bf16.mxu0 %v3304_v17 }
 0xcec   : > { %v1826_v1 = vpop.xlane.xlu1 %1825 }
 0xced   : > { %3076 = vrcp.f32 %v1826_v1 }
 0xcf7   : > { %v3077_v5 = vpop.eup %3076 }
 0xd33   : > { %v1870_v6 = vpop.f32.mrb[40].mxu0 }
 0xd34   : > { %v1877_v7 = vmul.f32 %v3077_v5, %v1870_v6  ;;  %v2872_v42 = vpop.f32.mrb[41].mxu0  ;;  %v2658_v5 = vld [vmem:[%s4081_s13] ss:$0 sm:$0xff] }
 0xd35   : > { %v1873_v8 = vpop.f32.mrb[42].mxu0 }
 0xd36   : > { %v1878_v9 = vpack.c.bf16 %v1877_v7, %v1877_v7  ;;  %v2873_v10 = vpop.f32.mrb[43].mxu0  ;;  %v3042_v8 = vld [vmem:[%s3654_s21] sm:$0xff]  }
 0xd37   : > { %v3044_v10 = vld [vmem:[%s3654_s21 + $0x10] sm:$0xff]  }
 0xd38   : > { %2877 = vmatmul.mubr.msk.bf16.vlgmr.msra.gmra.mrb[40].mxu1 %vm832_vm3, %v1878_v9  ;;  %v3043_v9 = vld [vmem:[%s3654_s21 + $0x8] sm:$0xff]  }
 0xd39   : > { %2888 = vmatprep.mubr.msk.bf16.mxu1 %vm3305_vm2, %v3304_v17 }
 0xd3b   : > { %v1967_v38 = vpop.f32.mrb[44].mxu0 }
 0xd3c   : > { %v2884_v11 = vpop.f32.mrb[45].mxu0  ;;  %v1973_v12 = vsel %vm832_vm3, %v1967_v38, -inf }
 0xd3d   : > { %1974 = vmax.xlane.f32.xlu0 %v1973_v12  ;;  %v1970_v13 = vpop.f32.mrb[46].mxu0 }
 0xd3e   : > { %v2885_v18 = vpop.f32.mrb[47].mxu0 }
 0xd53   : > { %1983 = vrot.lane.b32.xlu0 %v3785_v0, %s3316_s3  ;;  %v3913_v0 = vadd.f32 %v2656_v24, %v2078_v14 }
 0xd55   : > { %v2105_v2 = vsel %vm712_vm1, %v3913_v0, 0.0 }
 0xdca   : > { %v1975_v19 = vpop.xlane.xlu0 %1974 }
 0xdcb   : > { %v1976_v20 = vsub.f32 %v1967_v38, %v1975_v19  ;;  %v3045_v38 = vld [vmem:[%s3654_s21 + $0x18] sm:$0xff]   ;;  %s4082_s21 = scalar_lea.vmem [#allocation8], %s3596_s5 }
 0xdcd   : > { %v1977_v21 = vmul.f32 1.442695, %v1976_v20 }
 0xdce   : > { %v1984_v22 = vpop.permute.xlu0 %1983 }
 0xdcf   : > { %3078 = vpow2.f32 %v1977_v21  ;;  %v1989_v23 = vsel %vm894_vm4, %v1984_v22, 0 }
 0xdd0   : > { %2887 = vmatpush3.bf16.msra.mxu1 %v1989_v23  ;;  %v2659_v23 = vld [vmem:[%s4082_s21] ss:$0 sm:$0xff] }
 0xdd1   : > { %2898 = vmatprep.subr.bf16.mxu1 %v3304_v17 }
 0xdd9   : > { %v3079_v25 = vpop.eup %3078 }
 0xdda   : > { %v1979_v26 = vsel %vm832_vm3, %v3079_v25, 0.0  ;;  %v1982_v27 = vpack.c.bf16 %v3079_v25, %v3079_v25 }
 0xddb   : > { %1980 = vadd.xlane.f32.xlu1 %v1979_v26 }
 0xddc   : > { %2889 = vmatmul.mubr.msk.bf16.vlgmr.msra.gmra.mrb[44].mxu1 %vm832_vm3, %v1982_v27 }
 0xddd   : > { %2902 = vmatprep.mubr.msk.bf16.mxu1 %vm3305_vm2, %v3304_v17  ;;  %2899 = vmatpush3.bf16.msra.mxu1 %v3040_v53 }
 0xdde   : > { %2900 = vmatprep.subr.bf16.mxu1 %v3304_v17 }
 0xddf   : > { %2106 = vadd.xlane.f32.xlu1 %v2105_v2 }
 0xde1   : > { %2901 = vmatpush3.bf16.msra.mxu1 %v3041_v54 }
 0xde2   : > { %2918 = vmatprep.subr.bf16.mxu1 %v3304_v17 }
 0xe0b   : > { %v1916_v15 = vpop.f32.mrb[40].mxu1 }
 0xe0c   : > { %v1922_v28 = vadd.f32 %v1916_v15, %v3878_v45  ;;  %v2878_v41 = vpop.f32.mrb[41].mxu1 }
 0xe0d   : > { %v1919_v29 = vpop.f32.mrb[42].mxu1 }
 0xe0e   : > { %v2879_v30 = vpop.f32.mrb[43].mxu1 }
 0xe68   : > { %v1981_v31 = vpop.xlane.xlu1 %1980 }
 0xe69   : > { %3080 = vrcp.f32 %v1981_v31 }
 0xe6c   : > { %v2107_v39 = vpop.xlane.xlu1 %2106 }
 0xe6d   : > { %v2108_v40 = vmul.f32 0.03125, %v2107_v39 }
 0xe6f   : > { %v2109_v47 = vsub.f32 %v3913_v0, %v2108_v40 }
 0xe71   : > { %v2110_v4 = vmul.f32 %v2109_v47, %v2109_v47 }
 0xe73   : > { %v3081_v32 = vpop.eup %3080  ;;  %v2111_v52 = vsel %vm712_vm1, %v2110_v4, 0.0  ;;  %v2663_v4 = vld [vmem:[%s696_s24] ss:$0 sm:$0xff] }
 0xeaf   : > { %v2025_v33 = vpop.f32.mrb[44].mxu1 }
 0xeb0   : > { %v2032_v34 = vmul.f32 %v3081_v32, %v2025_v33  ;;  %v2890_v35 = vpop.f32.mrb[45].mxu1 }
 0xeb1   : > { %v2028_v36 = vpop.f32.mrb[46].mxu1 }
 0xeb2   : > { %v2033_v37 = vpack.c.bf16 %v2032_v34, %v2032_v34  ;;  %v2891_v16 = vpop.f32.mrb[47].mxu1 }
 0xeb4   : > { %2895 = vmatmul.mubr.msk.bf16.vlgmr.msra.gmra.mrb[48].mxu0 %vm832_vm3, %v2033_v37 }
 0xeb5   : > { %2914 = vmatprep.mubr.msk.bf16.mxu0 %vm3305_vm2, %v3304_v17  ;;  %2907 = vmatpush3.bf16.msra.mxu0 %v3042_v8 }
 0xeb6   : > { %2908 = vmatprep.subr.bf16.mxu0 %v3304_v17 }
 0xeb9   : > { %2909 = vmatpush3.bf16.msra.mxu0 %v3043_v9 }
 0xeba   : > { %2910 = vmatprep.subr.bf16.mxu0 %v3304_v17 }
 0xebd   : > { %2911 = vmatpush3.bf16.msra.mxu0 %v3044_v10 }
 0xebe   : > { %2912 = vmatprep.subr.bf16.mxu0 %v3304_v17 }
 0xec1   : > { %2913 = vmatpush3.bf16.msra.mxu0 %v3045_v38 }
 0xf87   : > { %v2071_v43 = vpop.f32.mrb[48].mxu0 }
 0xf88   : > { %v2077_v44 = vadd.f32 %v2071_v43, %v1922_v28  ;;  %v2896_v45 = vpop.f32.mrb[49].mxu0 }
 0xf89   : > { %v2074_v46 = vpop.f32.mrb[50].mxu0 }
 0xf8a   : > { %v2079_v48 = vadd.f32 %v2077_v44, %v3659_v3  ;;  %v2897_v49 = vpop.f32.mrb[51].mxu0 }
 0xf8c   : > { %v3927_v50 = vadd.f32 %v2656_v24, %v2079_v48 }
 0xf8e   : > { %v2279_v51 = vsel %vm712_vm1, %v3927_v50, 0.0 }
 0xf8f   : > { %2280 = vadd.xlane.f32.xlu1 %v2279_v51 }
 0xf93   : > { %2112 = vadd.xlane.f32.xlu1 %v2111_v52 }
0x101c   : > { %v2281_v3 = vpop.xlane.xlu1 %2280 }
0x101d   : > { %v2282_v55 = vmul.f32 0.03125, %v2281_v3 }
0x101f   : > { %v2283_v56 = vsub.f32 %v3927_v50, %v2282_v55 }
0x1020   : > { %v2113_v57 = vpop.xlane.xlu1 %2112 }
0x1021   : > { %v2114_v58 = vmul.f32 0.03125, %v2113_v57  ;;  %v2284_v59 = vmul.f32 %v2283_v56, %v2283_v56 }
0x1023   : > { %v2115_v60 = vadd.f32 1e-05, %v2114_v58  ;;  %v2285_v61 = vsel %vm712_vm1, %v2284_v59, 0.0 }
0x1024   : > { %2286 = vadd.xlane.f32.xlu1 %v2285_v61 }
0x1025   : > { %3082 = vrsqrt.f32 %v2115_v60 }
0x102f   : > { %v3083_v62 = vpop.eup %3082 }
0x1030   : > { %v2117_v1 = vmul.f32 %v3083_v62, %v2109_v47 }
0x1032   : > { %v2124_v6 = vmul.f32 %v2657_v63, %v2117_v1 }
0x1034   : > { %v2131_v7 = vadd.f32 %v2658_v5, %v2124_v6 }
0x1036   : > { %v2132_v42 = vpack.c.bf16 %v2131_v7, %v2131_v7 }
0x1038   : > { %2903 = vmatmul.mubr.msk.bf16.vlgmr.msra.gmra.mrb[48].mxu1 %vm712_vm1, %v2132_v42 }
0x1039   : > { %2919 = vmatpush3.bf16.msra.mxu1 %v3040_v53  ;;  %2922 = vmatprep.mubr.msk.bf16.mxu1 %vm3305_vm2, %v3304_v17 }
0x103a   : > { %2920 = vmatprep.subr.bf16.mxu1 %v3304_v17 }
0x103d   : > { %2921 = vmatpush3.bf16.msra.mxu1 %v3041_v54 }
0x103e   : > { %2926 = vmatprep.subr.bf16.mxu1 %v3304_v17 }
0x10b1   : > { %v2287_v11 = vpop.xlane.xlu1 %2286 }
0x10b2   : > { %v2288_v12 = vmul.f32 0.03125, %v2287_v11 }
0x10b4   : > { %v2289_v13 = vadd.f32 1e-05, %v2288_v12 }
0x10b6   : > { %3084 = vrsqrt.f32 %v2289_v13 }
0x10c0   : > { %v3085_v18 = vpop.eup %3084 }
0x10c1   : > { %v2291_v19 = vmul.f32 %v3085_v18, %v2283_v56 }
0x10c3   : > { %v2292_v20 = vmul.f32 %v2657_v63, %v2291_v19 }
0x10c5   : > { %v2293_v21 = vadd.f32 %v2658_v5, %v2292_v20 }
0x10c7   : > { %v2294_v22 = vpack.c.bf16 %v2293_v21, %v2293_v21 }
0x10c9   : > { %2923 = vmatmul.mubr.msk.bf16.vlgmr.msra.gmra.mrb[52].mxu1 %vm712_vm1, %v2294_v22 }
0x10ca   : > { %2927 = vmatpush3.bf16.msra.mxu1 %v3042_v8  ;;  %2934 = vmatprep.mubr.msk.bf16.mxu1 %vm3305_vm2, %v3304_v17 }
0x10cb   : > { %2928 = vmatprep.subr.bf16.mxu1 %v3304_v17 }
0x10ce   : > { %2929 = vmatpush3.bf16.msra.mxu1 %v3043_v9 }
0x10cf   : > { %2930 = vmatprep.subr.bf16.mxu1 %v3304_v17 }
0x10d2   : > { %2931 = vmatpush3.bf16.msra.mxu1 %v3044_v10 }
0x10d3   : > { %2932 = vmatprep.subr.bf16.mxu1 %v3304_v17 }
0x10d6   : > { %2933 = vmatpush3.bf16.msra.mxu1 %v3045_v38 }
0x110b   : > { %v2188_v14 = vpop.f32.mrb[48].mxu1 }
0x110c   : > { %v2189_v24 = vadd.f32 %v2659_v23, %v2188_v14  ;;  %v2904_v25 = vpop.f32.mrb[49].mxu1 }
0x110d   : > { %v2191_v26 = vpop.f32.mrb[50].mxu1 }
0x110e   : > { %v2195_v27 = vmul.f32 0.044715, %v2189_v24  ;;  %v2905_v2 = vpop.f32.mrb[51].mxu1  ;;  %v2194_v31 = vmul.f32 0.5, %v2189_v24 }
0x1110   : > { %v2196_v15 = vmul.f32 %v2195_v27, %v2189_v24 }
0x1112   : > { %v2197_v28 = vmul.f32 %v2196_v15, %v2189_v24 }
0x1114   : > { %v2198_v41 = vadd.f32 %v2197_v28, %v2189_v24 }
0x1116   : > { %v2199_v29 = vmul.f32 0.7978846, %v2198_v41 }
0x1118   : > { %3086 = vtanh.f32 %v2199_v29 }
0x1122   : > { %v3087_v30 = vpop.eup %3086 }
0x1123   : > { %v2201_v32 = vadd.f32 1.0, %v3087_v30 }
0x1125   : > { %v2202_v33 = vmul.f32 %v2201_v32, %v2194_v31 }
0x1127   : > { %v2203_v17 = vpack.c.bf16 %v2202_v33, %v2202_v33 }
0x1129   : > { %2915 = vmatmul.mubr.msk.bf16.vlgmr.msra.gmra.mrb[52].mxu0 %vm2234_vm5, %v2203_v17 }
0x119c   : > { %v2332_v34 = vpop.f32.mrb[52].mxu1 }
0x119d   : > { %v2333_v35 = vadd.f32 %v2659_v23, %v2332_v34  ;;  %v2924_v36 = vpop.f32.mrb[53].mxu1 }
0x119e   : > { %v2335_v37 = vpop.f32.mrb[54].mxu1 }
0x119f   : > { %v2339_v16 = vmul.f32 0.044715, %v2333_v35  ;;  %v2925_v39 = vpop.f32.mrb[55].mxu1  ;;  %v2338_v47 = vmul.f32 0.5, %v2333_v35 }
0x11a1   : > { %v2340_v40 = vmul.f32 %v2339_v16, %v2333_v35 }
0x11a3   : > { %v2341_v43 = vmul.f32 %v2340_v40, %v2333_v35 }
0x11a5   : > { %v2342_v44 = vadd.f32 %v2341_v43, %v2333_v35 }
0x11a7   : > { %v2343_v45 = vmul.f32 0.7978846, %v2342_v44 }
0x11a9   : > { %3088 = vtanh.f32 %v2343_v45 }
0x11b3   : > { %v3089_v46 = vpop.eup %3088 }
0x11b4   : > { %v2345_v48 = vadd.f32 1.0, %v3089_v46 }
0x11b6   : > { %v2346_v49 = vmul.f32 %v2345_v48, %v2338_v47 }
0x11b8   : > { %v2347_v51 = vpack.c.bf16 %v2346_v49, %v2346_v49 }
0x11ba   : > { %2935 = vmatmul.mubr.msk.bf16.vlgmr.msra.gmra.mrb[56].mxu1 %vm2234_vm5, %v2347_v51 }
0x11fc   : > { %v2272_v52 = vpop.f32.mrb[52].mxu0 }
0x11fd   : > { %v2273_v53 = vadd.f32 %v2663_v4, %v2272_v52  ;;  %v2916_v54 = vpop.f32.mrb[53].mxu0 }
0x11fe   : > { %v2275_v3 = vpop.f32.mrb[54].mxu0 }
0x11ff   : > { %v2278_v55 = vadd.f32 %v2273_v53, %v3913_v0  ;;  %v2917_v56 = vpop.f32.mrb[55].mxu0 }
0x1201   : > { %2392 = vst.msk [vmem:[#allocation10] sm:$0xff] %vm712_vm1, %v2278_v55 }
0x128d   : > { %v2385_v57 = vpop.f32.mrb[56].mxu1 }
0x128e   : > { %v2386_v58 = vadd.f32 %v2663_v4, %v2385_v57  ;;  %v2936_v59 = vpop.f32.mrb[57].mxu1 }
0x128f   : > { %v2388_v60 = vpop.f32.mrb[58].mxu1 }
0x1290   : > { %v2391_v61 = vadd.f32 %v2386_v58, %v3927_v50  ;;  %v2937_v62 = vpop.f32.mrb[59].mxu1 }
0x1292   : > { %2393 = vst.msk [vmem:[#allocation10 + $0x8] sm:$0xff] %vm712_vm1, %v2391_v61 }
0x1293   : > { %3221 = shalt.err (!%p3218_p12)
}
0x1294   : > { %s4084_s18 = sld [smem:[#allocation29_spill]] }
0x129a   : > { %s3222_s9 = scalar_lea.hbm %s4084_s18, 256 }
0x129b   : > { %p3223_p11 = scmp.ne.s32.totalorder %s4084_s18, %s3222_s9  ;;  %p3228_p6 = scmp.lt.u32.totalorder %s3222_s9, %s4084_s18 }
0x129d   : > { %p3224_p5 = pnand %p3223_p11, %p2969_p4 }
0x129f   : > { %p3225_p9 = pneg %p3224_p5 }
0x12a1   : > { %p3230_p0 = pnand %p3228_p6, %p3225_p9 }
0x12a3   : > { %3233 = shalt.err (!%p3230_p0)
}
0x12a4   : > { %s3318_s22 = smov 128   ;;  %s3319_s19 = smov 8  }
0x12a5   : > { %2949 = dma.vmem_to_hbm [thread:$0]  (%p2969_p4), %s2404_s29, 256, %s4084_s18, [#allocation4], %s3318_s22, %s3318_s22, %s3319_s19  }
0x12a6   : > { %3271 = dma.done.wait (%p2969_p4), [#allocation4], 256  }
0x12a7   : > { %3273 = vsyncadd (%p2969_p4), [#allocation4], 4294967040 }
0x12a8 PF: > { %s4085_s3 = sld [smem:[#allocation17_spill]]  ;;  %s4086_s14 = sld [smem:[#allocation15_spill]] }
0x12a9   : > { %s4087_s27 = sld [smem:[#allocation19_spill]]  ;;  %s4088_s28 = sld [smem:[#allocation16_spill]] }
0x12aa   : > { %s4089_s29 = sld [smem:[#allocation18_spill]]  ;;  %s4090_s25 = smov %s3280_s26 }
0x12ae   : > { %s31_s30 = sadd.s32 1, %s4085_s3   ;;  %s4091_s26 = smov %s4086_s14 }
0x12af   : > { %p28_p1 = scmp.ge.s32.totalorder %s31_s30, 4  }
0x12b1   :  { %30 = sbr.rel (!%p28_p1) target bundleno = 19 (0x13), region = 171 }
0x12b8   :  { %2419 = vsyncpa [#allocation3], 1 }
0x12b9   :  { %2421 = vsyncpa [#allocation3 + $0x1], 1 }
0x12ba   :  { %2422 = vsyncpa [#allocation6], 1 }
0x12bb   :  { %2424 = vsyncpa [#allocation6 + $0x1], 1 }
0x12bc   :  { %2425 = vsyncpa [#allocation9], 1 }
0x12bd   :  { %2427 = vsyncpa [#allocation9 + $0x1], 1 }
0x12be   :  { %2428 = vsyncpa [#allocation4], 1 }
0x12bf   :  { %2430 = vsyncpa [#allocation4 + $0x1], 1 }

</bundles_post_ra>
